<compile_context>
chip_gen: v5e
topology: v5e:2x2
jax: 0.10.0
libtpu: 0.0.40
codegen_flags: <defaults>
</compile_context>

<pallas_src>
import math
import numpy as np
import jax
import jax.numpy as jnp
from jax import lax
from jax.experimental import pallas as pl
from jax.experimental.pallas import tpu as pltpu


def _round_up(v, m):
    return (v + m - 1) // m * m


def _make_resblock_kernel(H, W, Cin):
    Wq = W + 2                       # padded plane width
    Ho, Wo = H // 2, W // 2
    M1w = H * Wq                     # conv1 rows ("wide": includes 2 pad cols/row)
    KT = 9 * Cin                     # conv2 im2col depth / plane lane width
    ZR = _round_up(2 * Wq + 2, 8)    # top border rows that must be zero
    BASE = Wq + 1                    # first plane row conv2 reads
    inv_sqrt2 = 1.0 / math.sqrt(2.0)
    slope = 0.01                     # F.leaky_relu default negative_slope

    def kernel(xcol_ref, pool_ref, w1_ref, w2_ref, b2_ref, ws_ref, bs_ref,
               o_ref, y_ref):
        f32, bf16 = jnp.float32, jnp.bfloat16

        # Zero only the small top border of the conv2 plane: the only rows the
        # conv2 loads can touch that the tap stores below never write.
        y_ref[pl.ds(0, ZR), :] = jnp.zeros((ZR, KT), f32)

        # conv1 + bias as ONE fat-K matmul (bf16 operands, f32 accumulate).
        # Weights are replicated over the 9 tap lane blocks, so lane block t of
        # h1 holds a full copy of the conv1 output; width-pad rows are exactly
        # 0 because their whole im2col row (incl. the bias ones-lane) is 0.
        h1 = jnp.dot(xcol_ref[...], w1_ref[...], preferred_element_type=f32)
        h1 = jnp.maximum(h1, slope * h1)          # leaky_relu (f32, VPU)

        # Scatter h1 into the conv2 im2col plane: tap (kh, kw) -> lane block
        # t = kh*3+kw at row offset (2-kh)*Wq + (2-kw).  After this, plane row
        # BASE + 2*ho*Wq + 2*wo holds, in lane block t, exactly
        # h1[2*ho+kh-1, 2*wo+kw-1] (or 0 on the padded border).
        for kh in range(3):
            for kw in range(3):
                t = kh * 3 + kw
                off = (2 - kh) * Wq + (2 - kw)
                y_ref[pl.ds(off, M1w), t * Cin:(t + 1) * Cin] = \
                    h1[:, t * Cin:(t + 1) * Cin]

        w2m = w2_ref[...]
        wsm = ws_ref[...]
        b2v = b2_ref[...]
        bsv = bs_ref[...]

        # conv2 (3x3, stride 2) + skip (1x1 conv o 2x2 avg-pool) + residual,
        # one compact output row (Wo pixels) at a time.  Each conv2 tile is a
        # single K = 9*Cin matmul thanks to the tap-packed plane.
        # (Ho is small here; for very large H this loop would become a
        # lax.fori_loop to bound code size.)
        for ho in range(Ho):
            lhs = y_ref[pl.ds(BASE + 2 * ho * Wq, Wo, stride=2), :]
            h2 = jnp.dot(lhs.astype(bf16), w2m,
                         preferred_element_type=f32) + b2v
            h2 = jnp.maximum(h2, slope * h2)
            pool = pool_ref[pl.ds(ho * Wo, Wo), :]
            sk = jnp.dot(pool, wsm, preferred_element_type=f32) + bsv
            o_ref[pl.ds(ho * Wo, Wo), :] = \
                ((h2 + sk) * inv_sqrt2).astype(o_ref.dtype)

    return kernel


def resblock_pallas(x_nhwc, params):
    """ResBlock forward.  x_nhwc: (N, H, W, Cin) f32 -> (N, H//2, W//2, Cout) f32."""
    w1, b1, w2, b2, ws, bs = params
    N, H, W, Cin = x_nhwc.shape
    Cout = w2.shape[0]
    assert H % 2 == 0 and W % 2 == 0, "ResBlock downsamples by 2"
    KT = 9 * Cin
    K1 = KT + 1
    # TODO(synk): for 9*Cin + 1 > 128, fall back to per-tap K-blocked matmuls
    # (the v1 layout with dense 128-deep taps); this im2col path is the
    # small-channel specialisation the review asked for.
    assert K1 <= 128, "im2col path requires 9*in_channels + 1 <= 128"

    Wq = W + 2
    Ho, Wo = H // 2, W // 2
    M1w = H * Wq                         # wide conv1 rows
    M2c = Ho * Wo                        # compact output rows
    K1p = _round_up(K1, 8)               # conv1 im2col lane width (bf16-friendly)
    Ry = _round_up((H + 2) * Wq + 2, 8)  # conv2 plane rows

    f32, bf16 = jnp.float32, jnp.bfloat16
    x = x_nhwc.astype(f32)

    # conv1 im2col on wide rows (row = h*(W+2)+w): 9 tap lane blocks + a ones
    # lane carrying bias1 (+ zero lanes up to K1p).  Width-pad rows (w >= W)
    # are zeroed entirely so conv1's output is exactly 0 there.
    xpad = jnp.pad(x, ((0, 0), (1, 1), (1, 3), (0, 0)))
    cols = [xpad[:, kh:kh + H, kw:kw + Wq, :]
            for kh in range(3) for kw in range(3)]
    cols.append(jnp.ones((N, H, Wq, 1), f32))
    if K1p > K1:
        cols.append(jnp.zeros((N, H, Wq, K1p - K1), f32))
    colmask = (jnp.arange(Wq) < W).astype(f32)[None, None, :, None]
    xcol = (jnp.concatenate(cols, axis=-1) * colmask)
    xcol = xcol.reshape(N, M1w, K1p).astype(bf16)

    # Skip path: 2x2 average pool of x (the 1x1 conv commutes with the pool),
    # on compact Ho*Wo rows, shipped bf16.
    pooled = x.reshape(N, Ho, 2, Wo, 2, Cin).mean(axis=(2, 4))
    pooled = pooled.reshape(N, M2c, Cin).astype(bf16)

    # Folded weights (bf16 for the MXU; biases kept f32 for the VPU adds).
    w1m = jnp.transpose(jnp.asarray(w1, f32), (2, 3, 1, 0)).reshape(KT, Cin)
    w1aug = jnp.concatenate([w1m, jnp.asarray(b1, f32).reshape(1, Cin)], axis=0)
    w1aug = jnp.pad(w1aug, ((0, K1p - K1), (0, 0)))
    w1rep = jnp.tile(w1aug, (1, 9)).astype(bf16)                       # (K1p, KT)
    w2m = jnp.transpose(jnp.asarray(w2, f32),
                        (2, 3, 1, 0)).reshape(KT, Cout).astype(bf16)   # (KT, Cout)
    wsm = jnp.asarray(ws, f32)[:, :, 0, 0].T.astype(bf16)              # (Cin, Cout)
    b2v = jnp.asarray(b2, f32).reshape(1, Cout)
    bsv = jnp.asarray(bs, f32).reshape(1, Cout)

    kernel = _make_resblock_kernel(H, W, Cin)

    # Explicit VMEM budget (double-buffered inputs/outputs + scratch plane).
    est = (2 * (M1w * K1p + M2c * Cin) * 2                    # bf16 activation blocks
           + 2 * ((K1p * KT + KT * Cout + Cin * Cout) * 2 + 2 * Cout * 4)
           + 2 * M2c * Cout * 4                               # output blocks
           + Ry * KT * 4)                                     # conv2 plane scratch
    vmem_limit = int(min(64 * 2 ** 20, max(8 * 2 ** 20, 2 * est)))

    out = pl.pallas_call(
        kernel,
        out_shape=jax.ShapeDtypeStruct((N, M2c, Cout), f32),
        grid=(N,),
        in_specs=[
            pl.BlockSpec((None, M1w, K1p), lambda n: (n, 0, 0)),  # conv1 im2col
            pl.BlockSpec((None, M2c, Cin), lambda n: (n, 0, 0)),  # pooled x (skip)
            pl.BlockSpec((K1p, KT), lambda n: (0, 0)),            # conv1 W (+bias, replicated)
            pl.BlockSpec((KT, Cout), lambda n: (0, 0)),           # conv2 W (tap-stacked)
            pl.BlockSpec((1, Cout), lambda n: (0, 0)),            # b2
            pl.BlockSpec((Cin, Cout), lambda n: (0, 0)),          # skip 1x1 W
            pl.BlockSpec((1, Cout), lambda n: (0, 0)),            # bs
        ],
        out_specs=pl.BlockSpec((None, M2c, Cout), lambda n: (n, 0, 0)),
        scratch_shapes=[pltpu.VMEM((Ry, KT), f32)],               # conv2 im2col plane
        compiler_params=pltpu.CompilerParams(
            dimension_semantics=("parallel",),
            vmem_limit_bytes=vmem_limit),
    )(xcol, pooled, w1rep, w2m, b2v, wsm, bsv)

    # Compact output: pure reshape, no post-kernel slicing.
    return out.reshape(N, Ho, Wo, Cout)


def _leaky(x):
    return jnp.maximum(x, 0.01 * x)


def resblock_ref(x, params):
    """Pure-JAX reference mirroring the PyTorch module (NCHW)."""
    w1, b1, w2, b2, ws, bs = params

    def conv(x, w, b, stride, pad):
        y = lax.conv_general_dilated(
            x, w, (stride, stride), [(pad, pad), (pad, pad)],
            dimension_numbers=('NCHW', 'OIHW', 'NCHW'))
        return y + b[None, :, None, None]

    h = _leaky(conv(x, w1, b1, 1, 1))
    h = _leaky(conv(h, w2, b2, 2, 1))
    s = conv(x, ws, bs, 1, 0)
    N, C, H, W = s.shape
    s = s.reshape(N, C, H // 2, 2, W // 2, 2).mean(axis=(3, 5))
    return (h + s) / math.sqrt(2.0)


if __name__ == "__main__":
    key = jax.random.PRNGKey(0)
    N, Cin, Cout, H, W = 2, 4, 8, 16, 16
    ks = jax.random.split(key, 7)

    x_nchw = jax.random.normal(ks[0], (N, Cin, H, W), jnp.float32)
    # Deterministic synthetic parameters (shapes from the nn.Conv2d definitions).
    w1 = jax.random.normal(ks[1], (Cin, Cin, 3, 3), jnp.float32) * 0.2
    b1 = jax.random.normal(ks[2], (Cin,), jnp.float32) * 0.1
    w2 = jax.random.normal(ks[3], (Cout, Cin, 3, 3), jnp.float32) * 0.2
    b2 = jax.random.normal(ks[4], (Cout,), jnp.float32) * 0.1
    ws = jax.random.normal(ks[5], (Cout, Cin, 1, 1), jnp.float32) * 0.2
    bs = jax.random.normal(ks[6], (Cout,), jnp.float32) * 0.1
    params = (w1, b1, w2, b2, ws, bs)

    # The Pallas path consumes NHWC (no NCHW<->NHWC shuffles around the kernel).
    x_nhwc = jnp.transpose(x_nchw, (0, 2, 3, 1))

    fwd = jax.jit(resblock_pallas)
    out = jax.block_until_ready(fwd(x_nhwc, params))
    assert out.shape == (N, H // 2, W // 2, Cout)

    ref = jnp.transpose(resblock_ref(x_nchw, params), (0, 2, 3, 1))
    # bf16 MXU operands (incl. bf16-shipped activations) with f32 accumulation
    # -> relaxed tolerance; intentional precision choice for a discriminator.
    np.testing.assert_allclose(np.asarray(out), np.asarray(ref),
                               rtol=3e-2, atol=3e-2)
    print("KERNEL_OK")
</pallas_src>

<mosaic_0001>
module attributes {stable_mosaic.version = 11 : i64} {
  func.func @kernel(%arg0: i32, %arg1: memref<1x288x40xbf16, #tpu.memory_space<vmem>>, %arg2: memref<1x64x4xbf16, #tpu.memory_space<vmem>>, %arg3: memref<40x36xbf16, #tpu.memory_space<vmem>>, %arg4: memref<36x8xbf16, #tpu.memory_space<vmem>>, %arg5: memref<1x8xf32, #tpu.memory_space<vmem>>, %arg6: memref<4x8xbf16, #tpu.memory_space<vmem>>, %arg7: memref<1x8xf32, #tpu.memory_space<vmem>>, %arg8: memref<1x64x8xf32, #tpu.memory_space<vmem>>, %arg9: memref<328x36xf32, #tpu.memory_space<vmem>>) attributes {dimension_semantics = [#tpu.dimension_semantics<parallel>], iteration_bounds = array<i64: 2>, scalar_prefetch = 0 : i64, scratch_operands = 1 : i64, tpu.core_type = #tpu.core_type<tc>, window_params = [{transform_indices = @transform_0, window_bounds = array<i64: 1, 288, 40>}, {transform_indices = @transform_1, window_bounds = array<i64: 1, 64, 4>}, {pipeline_mode = #tpu.pipeline_mode<synchronous>, transform_indices = @transform_2, window_bounds = array<i64: 40, 36>}, {pipeline_mode = #tpu.pipeline_mode<synchronous>, transform_indices = @transform_3, window_bounds = array<i64: 36, 8>}, {pipeline_mode = #tpu.pipeline_mode<synchronous>, transform_indices = @transform_4, window_bounds = array<i64: 1, 8>}, {pipeline_mode = #tpu.pipeline_mode<synchronous>, transform_indices = @transform_5, window_bounds = array<i64: 4, 8>}, {pipeline_mode = #tpu.pipeline_mode<synchronous>, transform_indices = @transform_6, window_bounds = array<i64: 1, 8>}, {transform_indices = @transform_7, window_bounds = array<i64: 1, 64, 8>}]} {
    %cst = arith.constant 0.000000e+00 : f32
    %0 = vector.broadcast %cst : f32 to vector<40x36xf32>
    %c0 = arith.constant 0 : index
    %c0_0 = arith.constant 0 : index
    %1 = vector.load %arg9[%c0, %c0_0] : memref<328x36xf32, #tpu.memory_space<vmem>>, vector<40x36xf32>
    tpu.vector_store %arg9[%c0, %c0_0], %0 {strides = array<i32>} : memref<328x36xf32, #tpu.memory_space<vmem>>, vector<40x36xf32>,
    %c0_1 = arith.constant 0 : index
    %c0_2 = arith.constant 0 : index
    %c0_3 = arith.constant 0 : index
    %2 = vector.load %arg1[%c0_1, %c0_2, %c0_3] : memref<1x288x40xbf16, #tpu.memory_space<vmem>>, vector<1x288x40xbf16>
    %3 = vector.shape_cast %2 : vector<1x288x40xbf16> to vector<288x40xbf16>
    %c0_4 = arith.constant 0 : index
    %c0_5 = arith.constant 0 : index
    %4 = vector.load %arg3[%c0_4, %c0_5] : memref<40x36xbf16, #tpu.memory_space<vmem>>, vector<40x36xbf16>
    %cst_6 = arith.constant dense<0.000000e+00> : vector<288x36xf32>
    %5 = tpu.matmul %3, %4, %cst_6 {dimension_numbers = #tpu.dot_dimension_numbers<[1], [0], [0], [1], [0, 0, 1, 1], [], []>} : vector<288x40xbf16>, vector<40x36xbf16>, vector<288x36xf32> -> vector<288x36xf32>
    %cst_7 = arith.constant 0.00999999977 : f32
    %6 = vector.broadcast %cst_7 : f32 to vector<288x36xf32>
    %7 = arith.mulf %6, %5 : vector<288x36xf32>
    %8 = arith.maximumf %5, %7 : vector<288x36xf32>
    %9 = vector.extract_strided_slice %8 {offsets = [0, 0], sizes = [288, 4], strides = [1, 1]} : vector<288x36xf32> to vector<288x4xf32>
    %c38 = arith.constant 38 : index
    %c0_8 = arith.constant 0 : index
    %10 = vector.load %arg9[%c38, %c0_8] : memref<328x36xf32, #tpu.memory_space<vmem>>, vector<288x4xf32>
    tpu.vector_store %arg9[%c38, %c0_8], %9 {strides = array<i32>} : memref<328x36xf32, #tpu.memory_space<vmem>>, vector<288x4xf32>,
    %11 = vector.extract_strided_slice %8 {offsets = [0, 4], sizes = [288, 4], strides = [1, 1]} : vector<288x36xf32> to vector<288x4xf32>
    %c37 = arith.constant 37 : index
    %c4 = arith.constant 4 : index
    %12 = vector.load %arg9[%c37, %c4] : memref<328x36xf32, #tpu.memory_space<vmem>>, vector<288x4xf32>
    tpu.vector_store %arg9[%c37, %c4], %11 {strides = array<i32>} : memref<328x36xf32, #tpu.memory_space<vmem>>, vector<288x4xf32>,
    %13 = vector.extract_strided_slice %8 {offsets = [0, 8], sizes = [288, 4], strides = [1, 1]} : vector<288x36xf32> to vector<288x4xf32>
    %c36 = arith.constant 36 : index
    %c8 = arith.constant 8 : index
    %14 = vector.load %arg9[%c36, %c8] : memref<328x36xf32, #tpu.memory_space<vmem>>, vector<288x4xf32>
    tpu.vector_store %arg9[%c36, %c8], %13 {strides = array<i32>} : memref<328x36xf32, #tpu.memory_space<vmem>>, vector<288x4xf32>,
    %15 = vector.extract_strided_slice %8 {offsets = [0, 12], sizes = [288, 4], strides = [1, 1]} : vector<288x36xf32> to vector<288x4xf32>
    %c20 = arith.constant 20 : index
    %c12 = arith.constant 12 : index
    %16 = vector.load %arg9[%c20, %c12] : memref<328x36xf32, #tpu.memory_space<vmem>>, vector<288x4xf32>
    tpu.vector_store %arg9[%c20, %c12], %15 {strides = array<i32>} : memref<328x36xf32, #tpu.memory_space<vmem>>, vector<288x4xf32>,
    %17 = vector.extract_strided_slice %8 {offsets = [0, 16], sizes = [288, 4], strides = [1, 1]} : vector<288x36xf32> to vector<288x4xf32>
    %c19 = arith.constant 19 : index
    %c16 = arith.constant 16 : index
    %18 = vector.load %arg9[%c19, %c16] : memref<328x36xf32, #tpu.memory_space<vmem>>, vector<288x4xf32>
    tpu.vector_store %arg9[%c19, %c16], %17 {strides = array<i32>} : memref<328x36xf32, #tpu.memory_space<vmem>>, vector<288x4xf32>,
    %19 = vector.extract_strided_slice %8 {offsets = [0, 20], sizes = [288, 4], strides = [1, 1]} : vector<288x36xf32> to vector<288x4xf32>
    %c18 = arith.constant 18 : index
    %c20_9 = arith.constant 20 : index
    %20 = vector.load %arg9[%c18, %c20_9] : memref<328x36xf32, #tpu.memory_space<vmem>>, vector<288x4xf32>
    tpu.vector_store %arg9[%c18, %c20_9], %19 {strides = array<i32>} : memref<328x36xf32, #tpu.memory_space<vmem>>, vector<288x4xf32>,
    %21 = vector.extract_strided_slice %8 {offsets = [0, 24], sizes = [288, 4], strides = [1, 1]} : vector<288x36xf32> to vector<288x4xf32>
    %c2 = arith.constant 2 : index
    %c24 = arith.constant 24 : index
    %22 = vector.load %arg9[%c2, %c24] : memref<328x36xf32, #tpu.memory_space<vmem>>, vector<288x4xf32>
    tpu.vector_store %arg9[%c2, %c24], %21 {strides = array<i32>} : memref<328x36xf32, #tpu.memory_space<vmem>>, vector<288x4xf32>,
    %23 = vector.extract_strided_slice %8 {offsets = [0, 28], sizes = [288, 4], strides = [1, 1]} : vector<288x36xf32> to vector<288x4xf32>
    %c1 = arith.constant 1 : index
    %c28 = arith.constant 28 : index
    %24 = vector.load %arg9[%c1, %c28] : memref<328x36xf32, #tpu.memory_space<vmem>>, vector<288x4xf32>
    tpu.vector_store %arg9[%c1, %c28], %23 {strides = array<i32>} : memref<328x36xf32, #tpu.memory_space<vmem>>, vector<288x4xf32>,
    %25 = vector.extract_strided_slice %8 {offsets = [0, 32], sizes = [288, 4], strides = [1, 1]} : vector<288x36xf32> to vector<288x4xf32>
    %c0_10 = arith.constant 0 : index
    %c32 = arith.constant 32 : index
    %26 = vector.load %arg9[%c0_10, %c32] : memref<328x36xf32, #tpu.memory_space<vmem>>, vector<288x4xf32>
    tpu.vector_store %arg9[%c0_10, %c32], %25 {strides = array<i32>} : memref<328x36xf32, #tpu.memory_space<vmem>>, vector<288x4xf32>,
    %c0_11 = arith.constant 0 : index
    %c0_12 = arith.constant 0 : index
    %27 = vector.load %arg4[%c0_11, %c0_12] : memref<36x8xbf16, #tpu.memory_space<vmem>>, vector<36x8xbf16>
    %c0_13 = arith.constant 0 : index
    %c0_14 = arith.constant 0 : index
    %28 = vector.load %arg6[%c0_13, %c0_14] : memref<4x8xbf16, #tpu.memory_space<vmem>>, vector<4x8xbf16>
    %c0_15 = arith.constant 0 : index
    %c0_16 = arith.constant 0 : index
    %29 = vector.load %arg5[%c0_15, %c0_16] : memref<1x8xf32, #tpu.memory_space<vmem>>, vector<1x8xf32>
    %c0_17 = arith.constant 0 : index
    %c0_18 = arith.constant 0 : index
    %30 = vector.load %arg7[%c0_17, %c0_18] : memref<1x8xf32, #tpu.memory_space<vmem>>, vector<1x8xf32>
    %c19_19 = arith.constant 19 : index
    %c0_20 = arith.constant 0 : index
    %31 = tpu.strided_load %arg9[%c19_19, %c0_20] {strides = array<i32: 2, 1>} : memref<328x36xf32, #tpu.memory_space<vmem>>, vector<8x36xf32>
    %32 = arith.truncf %31 : vector<8x36xf32> to vector<8x36xbf16>
    %cst_21 = arith.constant dense<0.000000e+00> : vector<8x8xf32>
    %33 = tpu.matmul %32, %27, %cst_21 {dimension_numbers = #tpu.dot_dimension_numbers<[1], [0], [0], [1], [0, 0, 1, 1], [], []>} : vector<8x36xbf16>, vector<36x8xbf16>, vector<8x8xf32> -> vector<8x8xf32>
    %34 = vector.broadcast %29 : vector<1x8xf32> to vector<8x8xf32>
    %35 = arith.addf %33, %34 : vector<8x8xf32>
    %cst_22 = arith.constant 0.00999999977 : f32
    %36 = vector.broadcast %cst_22 : f32 to vector<8x8xf32>
    %37 = arith.mulf %36, %35 : vector<8x8xf32>
    %38 = arith.maximumf %35, %37 : vector<8x8xf32>
    %c0_23 = arith.constant 0 : index
    %c0_24 = arith.constant 0 : index
    %c0_25 = arith.constant 0 : index
    %39 = vector.load %arg2[%c0_23, %c0_24, %c0_25] : memref<1x64x4xbf16, #tpu.memory_space<vmem>>, vector<1x8x4xbf16>
    %40 = vector.shape_cast %39 : vector<1x8x4xbf16> to vector<8x4xbf16>
    %cst_26 = arith.constant dense<0.000000e+00> : vector<8x8xf32>
    %41 = tpu.matmul %40, %28, %cst_26 {dimension_numbers = #tpu.dot_dimension_numbers<[1], [0], [0], [1], [0, 0, 1, 1], [], []>} : vector<8x4xbf16>, vector<4x8xbf16>, vector<8x8xf32> -> vector<8x8xf32>
    %42 = vector.broadcast %30 : vector<1x8xf32> to vector<8x8xf32>
    %43 = arith.addf %41, %42 : vector<8x8xf32>
    %44 = arith.addf %38, %43 : vector<8x8xf32>
    %cst_27 = arith.constant 0.707106769 : f32
    %45 = vector.broadcast %cst_27 : f32 to vector<8x8xf32>
    %46 = arith.mulf %44, %45 : vector<8x8xf32>
    %c0_28 = arith.constant 0 : index
    %c0_29 = arith.constant 0 : index
    %c0_30 = arith.constant 0 : index
    %47 = vector.load %arg8[%c0_28, %c0_29, %c0_30] : memref<1x64x8xf32, #tpu.memory_space<vmem>>, vector<1x8x8xf32>
    %48 = vector.shape_cast %47 : vector<1x8x8xf32> to vector<8x8xf32>
    %49 = vector.shape_cast %46 : vector<8x8xf32> to vector<1x8x8xf32>
    tpu.vector_store %arg8[%c0_28, %c0_29, %c0_30], %49 {strides = array<i32>} : memref<1x64x8xf32, #tpu.memory_space<vmem>>, vector<1x8x8xf32>,
    %c55 = arith.constant 55 : index
    %c0_31 = arith.constant 0 : index
    %50 = tpu.strided_load %arg9[%c55, %c0_31] {strides = array<i32: 2, 1>} : memref<328x36xf32, #tpu.memory_space<vmem>>, vector<8x36xf32>
    %51 = arith.truncf %50 : vector<8x36xf32> to vector<8x36xbf16>
    %cst_32 = arith.constant dense<0.000000e+00> : vector<8x8xf32>
    %52 = tpu.matmul %51, %27, %cst_32 {dimension_numbers = #tpu.dot_dimension_numbers<[1], [0], [0], [1], [0, 0, 1, 1], [], []>} : vector<8x36xbf16>, vector<36x8xbf16>, vector<8x8xf32> -> vector<8x8xf32>
    %53 = vector.broadcast %29 : vector<1x8xf32> to vector<8x8xf32>
    %54 = arith.addf %52, %53 : vector<8x8xf32>
    %cst_33 = arith.constant 0.00999999977 : f32
    %55 = vector.broadcast %cst_33 : f32 to vector<8x8xf32>
    %56 = arith.mulf %55, %54 : vector<8x8xf32>
    %57 = arith.maximumf %54, %56 : vector<8x8xf32>
    %c0_34 = arith.constant 0 : index
    %c8_35 = arith.constant 8 : index
    %c0_36 = arith.constant 0 : index
    %58 = vector.load %arg2[%c0_34, %c8_35, %c0_36] : memref<1x64x4xbf16, #tpu.memory_space<vmem>>, vector<1x8x4xbf16>
    %59 = vector.shape_cast %58 : vector<1x8x4xbf16> to vector<8x4xbf16>
    %cst_37 = arith.constant dense<0.000000e+00> : vector<8x8xf32>
    %60 = tpu.matmul %59, %28, %cst_37 {dimension_numbers = #tpu.dot_dimension_numbers<[1], [0], [0], [1], [0, 0, 1, 1], [], []>} : vector<8x4xbf16>, vector<4x8xbf16>, vector<8x8xf32> -> vector<8x8xf32>
    %61 = vector.broadcast %30 : vector<1x8xf32> to vector<8x8xf32>
    %62 = arith.addf %60, %61 : vector<8x8xf32>
    %63 = arith.addf %57, %62 : vector<8x8xf32>
    %cst_38 = arith.constant 0.707106769 : f32
    %64 = vector.broadcast %cst_38 : f32 to vector<8x8xf32>
    %65 = arith.mulf %63, %64 : vector<8x8xf32>
    %c0_39 = arith.constant 0 : index
    %c8_40 = arith.constant 8 : index
    %c0_41 = arith.constant 0 : index
    %66 = vector.load %arg8[%c0_39, %c8_40, %c0_41] : memref<1x64x8xf32, #tpu.memory_space<vmem>>, vector<1x8x8xf32>
    %67 = vector.shape_cast %66 : vector<1x8x8xf32> to vector<8x8xf32>
    %68 = vector.shape_cast %65 : vector<8x8xf32> to vector<1x8x8xf32>
    tpu.vector_store %arg8[%c0_39, %c8_40, %c0_41], %68 {strides = array<i32>} : memref<1x64x8xf32, #tpu.memory_space<vmem>>, vector<1x8x8xf32>,
    %c91 = arith.constant 91 : index
    %c0_42 = arith.constant 0 : index
    %69 = tpu.strided_load %arg9[%c91, %c0_42] {strides = array<i32: 2, 1>} : memref<328x36xf32, #tpu.memory_space<vmem>>, vector<8x36xf32>
    %70 = arith.truncf %69 : vector<8x36xf32> to vector<8x36xbf16>
    %cst_43 = arith.constant dense<0.000000e+00> : vector<8x8xf32>
    %71 = tpu.matmul %70, %27, %cst_43 {dimension_numbers = #tpu.dot_dimension_numbers<[1], [0], [0], [1], [0, 0, 1, 1], [], []>} : vector<8x36xbf16>, vector<36x8xbf16>, vector<8x8xf32> -> vector<8x8xf32>
    %72 = vector.broadcast %29 : vector<1x8xf32> to vector<8x8xf32>
    %73 = arith.addf %71, %72 : vector<8x8xf32>
    %cst_44 = arith.constant 0.00999999977 : f32
    %74 = vector.broadcast %cst_44 : f32 to vector<8x8xf32>
    %75 = arith.mulf %74, %73 : vector<8x8xf32>
    %76 = arith.maximumf %73, %75 : vector<8x8xf32>
    %c0_45 = arith.constant 0 : index
    %c16_46 = arith.constant 16 : index
    %c0_47 = arith.constant 0 : index
    %77 = vector.load %arg2[%c0_45, %c16_46, %c0_47] : memref<1x64x4xbf16, #tpu.memory_space<vmem>>, vector<1x8x4xbf16>
    %78 = vector.shape_cast %77 : vector<1x8x4xbf16> to vector<8x4xbf16>
    %cst_48 = arith.constant dense<0.000000e+00> : vector<8x8xf32>
    %79 = tpu.matmul %78, %28, %cst_48 {dimension_numbers = #tpu.dot_dimension_numbers<[1], [0], [0], [1], [0, 0, 1, 1], [], []>} : vector<8x4xbf16>, vector<4x8xbf16>, vector<8x8xf32> -> vector<8x8xf32>
    %80 = vector.broadcast %30 : vector<1x8xf32> to vector<8x8xf32>
    %81 = arith.addf %79, %80 : vector<8x8xf32>
    %82 = arith.addf %76, %81 : vector<8x8xf32>
    %cst_49 = arith.constant 0.707106769 : f32
    %83 = vector.broadcast %cst_49 : f32 to vector<8x8xf32>
    %84 = arith.mulf %82, %83 : vector<8x8xf32>
    %c0_50 = arith.constant 0 : index
    %c16_51 = arith.constant 16 : index
    %c0_52 = arith.constant 0 : index
    %85 = vector.load %arg8[%c0_50, %c16_51, %c0_52] : memref<1x64x8xf32, #tpu.memory_space<vmem>>, vector<1x8x8xf32>
    %86 = vector.shape_cast %85 : vector<1x8x8xf32> to vector<8x8xf32>
    %87 = vector.shape_cast %84 : vector<8x8xf32> to vector<1x8x8xf32>
    tpu.vector_store %arg8[%c0_50, %c16_51, %c0_52], %87 {strides = array<i32>} : memref<1x64x8xf32, #tpu.memory_space<vmem>>, vector<1x8x8xf32>,
    %c127 = arith.constant 127 : index
    %c0_53 = arith.constant 0 : index
    %88 = tpu.strided_load %arg9[%c127, %c0_53] {strides = array<i32: 2, 1>} : memref<328x36xf32, #tpu.memory_space<vmem>>, vector<8x36xf32>
    %89 = arith.truncf %88 : vector<8x36xf32> to vector<8x36xbf16>
    %cst_54 = arith.constant dense<0.000000e+00> : vector<8x8xf32>
    %90 = tpu.matmul %89, %27, %cst_54 {dimension_numbers = #tpu.dot_dimension_numbers<[1], [0], [0], [1], [0, 0, 1, 1], [], []>} : vector<8x36xbf16>, vector<36x8xbf16>, vector<8x8xf32> -> vector<8x8xf32>
    %91 = vector.broadcast %29 : vector<1x8xf32> to vector<8x8xf32>
    %92 = arith.addf %90, %91 : vector<8x8xf32>
    %cst_55 = arith.constant 0.00999999977 : f32
    %93 = vector.broadcast %cst_55 : f32 to vector<8x8xf32>
    %94 = arith.mulf %93, %92 : vector<8x8xf32>
    %95 = arith.maximumf %92, %94 : vector<8x8xf32>
    %c0_56 = arith.constant 0 : index
    %c24_57 = arith.constant 24 : index
    %c0_58 = arith.constant 0 : index
    %96 = vector.load %arg2[%c0_56, %c24_57, %c0_58] : memref<1x64x4xbf16, #tpu.memory_space<vmem>>, vector<1x8x4xbf16>
    %97 = vector.shape_cast %96 : vector<1x8x4xbf16> to vector<8x4xbf16>
    %cst_59 = arith.constant dense<0.000000e+00> : vector<8x8xf32>
    %98 = tpu.matmul %97, %28, %cst_59 {dimension_numbers = #tpu.dot_dimension_numbers<[1], [0], [0], [1], [0, 0, 1, 1], [], []>} : vector<8x4xbf16>, vector<4x8xbf16>, vector<8x8xf32> -> vector<8x8xf32>
    %99 = vector.broadcast %30 : vector<1x8xf32> to vector<8x8xf32>
    %100 = arith.addf %98, %99 : vector<8x8xf32>
    %101 = arith.addf %95, %100 : vector<8x8xf32>
    %cst_60 = arith.constant 0.707106769 : f32
    %102 = vector.broadcast %cst_60 : f32 to vector<8x8xf32>
    %103 = arith.mulf %101, %102 : vector<8x8xf32>
    %c0_61 = arith.constant 0 : index
    %c24_62 = arith.constant 24 : index
    %c0_63 = arith.constant 0 : index
    %104 = vector.load %arg8[%c0_61, %c24_62, %c0_63] : memref<1x64x8xf32, #tpu.memory_space<vmem>>, vector<1x8x8xf32>
    %105 = vector.shape_cast %104 : vector<1x8x8xf32> to vector<8x8xf32>
    %106 = vector.shape_cast %103 : vector<8x8xf32> to vector<1x8x8xf32>
    tpu.vector_store %arg8[%c0_61, %c24_62, %c0_63], %106 {strides = array<i32>} : memref<1x64x8xf32, #tpu.memory_space<vmem>>, vector<1x8x8xf32>,
    %c163 = arith.constant 163 : index
    %c0_64 = arith.constant 0 : index
    %107 = tpu.strided_load %arg9[%c163, %c0_64] {strides = array<i32: 2, 1>} : memref<328x36xf32, #tpu.memory_space<vmem>>, vector<8x36xf32>
    %108 = arith.truncf %107 : vector<8x36xf32> to vector<8x36xbf16>
    %cst_65 = arith.constant dense<0.000000e+00> : vector<8x8xf32>
    %109 = tpu.matmul %108, %27, %cst_65 {dimension_numbers = #tpu.dot_dimension_numbers<[1], [0], [0], [1], [0, 0, 1, 1], [], []>} : vector<8x36xbf16>, vector<36x8xbf16>, vector<8x8xf32> -> vector<8x8xf32>
    %110 = vector.broadcast %29 : vector<1x8xf32> to vector<8x8xf32>
    %111 = arith.addf %109, %110 : vector<8x8xf32>
    %cst_66 = arith.constant 0.00999999977 : f32
    %112 = vector.broadcast %cst_66 : f32 to vector<8x8xf32>
    %113 = arith.mulf %112, %111 : vector<8x8xf32>
    %114 = arith.maximumf %111, %113 : vector<8x8xf32>
    %c0_67 = arith.constant 0 : index
    %c32_68 = arith.constant 32 : index
    %c0_69 = arith.constant 0 : index
    %115 = vector.load %arg2[%c0_67, %c32_68, %c0_69] : memref<1x64x4xbf16, #tpu.memory_space<vmem>>, vector<1x8x4xbf16>
    %116 = vector.shape_cast %115 : vector<1x8x4xbf16> to vector<8x4xbf16>
    %cst_70 = arith.constant dense<0.000000e+00> : vector<8x8xf32>
    %117 = tpu.matmul %116, %28, %cst_70 {dimension_numbers = #tpu.dot_dimension_numbers<[1], [0], [0], [1], [0, 0, 1, 1], [], []>} : vector<8x4xbf16>, vector<4x8xbf16>, vector<8x8xf32> -> vector<8x8xf32>
    %118 = vector.broadcast %30 : vector<1x8xf32> to vector<8x8xf32>
    %119 = arith.addf %117, %118 : vector<8x8xf32>
    %120 = arith.addf %114, %119 : vector<8x8xf32>
    %cst_71 = arith.constant 0.707106769 : f32
    %121 = vector.broadcast %cst_71 : f32 to vector<8x8xf32>
    %122 = arith.mulf %120, %121 : vector<8x8xf32>
    %c0_72 = arith.constant 0 : index
    %c32_73 = arith.constant 32 : index
    %c0_74 = arith.constant 0 : index
    %123 = vector.load %arg8[%c0_72, %c32_73, %c0_74] : memref<1x64x8xf32, #tpu.memory_space<vmem>>, vector<1x8x8xf32>
    %124 = vector.shape_cast %123 : vector<1x8x8xf32> to vector<8x8xf32>
    %125 = vector.shape_cast %122 : vector<8x8xf32> to vector<1x8x8xf32>
    tpu.vector_store %arg8[%c0_72, %c32_73, %c0_74], %125 {strides = array<i32>} : memref<1x64x8xf32, #tpu.memory_space<vmem>>, vector<1x8x8xf32>,
    %c199 = arith.constant 199 : index
    %c0_75 = arith.constant 0 : index
    %126 = tpu.strided_load %arg9[%c199, %c0_75] {strides = array<i32: 2, 1>} : memref<328x36xf32, #tpu.memory_space<vmem>>, vector<8x36xf32>
    %127 = arith.truncf %126 : vector<8x36xf32> to vector<8x36xbf16>
    %cst_76 = arith.constant dense<0.000000e+00> : vector<8x8xf32>
    %128 = tpu.matmul %127, %27, %cst_76 {dimension_numbers = #tpu.dot_dimension_numbers<[1], [0], [0], [1], [0, 0, 1, 1], [], []>} : vector<8x36xbf16>, vector<36x8xbf16>, vector<8x8xf32> -> vector<8x8xf32>
    %129 = vector.broadcast %29 : vector<1x8xf32> to vector<8x8xf32>
    %130 = arith.addf %128, %129 : vector<8x8xf32>
    %cst_77 = arith.constant 0.00999999977 : f32
    %131 = vector.broadcast %cst_77 : f32 to vector<8x8xf32>
    %132 = arith.mulf %131, %130 : vector<8x8xf32>
    %133 = arith.maximumf %130, %132 : vector<8x8xf32>
    %c0_78 = arith.constant 0 : index
    %c40 = arith.constant 40 : index
    %c0_79 = arith.constant 0 : index
    %134 = vector.load %arg2[%c0_78, %c40, %c0_79] : memref<1x64x4xbf16, #tpu.memory_space<vmem>>, vector<1x8x4xbf16>
    %135 = vector.shape_cast %134 : vector<1x8x4xbf16> to vector<8x4xbf16>
    %cst_80 = arith.constant dense<0.000000e+00> : vector<8x8xf32>
    %136 = tpu.matmul %135, %28, %cst_80 {dimension_numbers = #tpu.dot_dimension_numbers<[1], [0], [0], [1], [0, 0, 1, 1], [], []>} : vector<8x4xbf16>, vector<4x8xbf16>, vector<8x8xf32> -> vector<8x8xf32>
    %137 = vector.broadcast %30 : vector<1x8xf32> to vector<8x8xf32>
    %138 = arith.addf %136, %137 : vector<8x8xf32>
    %139 = arith.addf %133, %138 : vector<8x8xf32>
    %cst_81 = arith.constant 0.707106769 : f32
    %140 = vector.broadcast %cst_81 : f32 to vector<8x8xf32>
    %141 = arith.mulf %139, %140 : vector<8x8xf32>
    %c0_82 = arith.constant 0 : index
    %c40_83 = arith.constant 40 : index
    %c0_84 = arith.constant 0 : index
    %142 = vector.load %arg8[%c0_82, %c40_83, %c0_84] : memref<1x64x8xf32, #tpu.memory_space<vmem>>, vector<1x8x8xf32>
    %143 = vector.shape_cast %142 : vector<1x8x8xf32> to vector<8x8xf32>
    %144 = vector.shape_cast %141 : vector<8x8xf32> to vector<1x8x8xf32>
    tpu.vector_store %arg8[%c0_82, %c40_83, %c0_84], %144 {strides = array<i32>} : memref<1x64x8xf32, #tpu.memory_space<vmem>>, vector<1x8x8xf32>,
    %c235 = arith.constant 235 : index
    %c0_85 = arith.constant 0 : index
    %145 = tpu.strided_load %arg9[%c235, %c0_85] {strides = array<i32: 2, 1>} : memref<328x36xf32, #tpu.memory_space<vmem>>, vector<8x36xf32>
    %146 = arith.truncf %145 : vector<8x36xf32> to vector<8x36xbf16>
    %cst_86 = arith.constant dense<0.000000e+00> : vector<8x8xf32>
    %147 = tpu.matmul %146, %27, %cst_86 {dimension_numbers = #tpu.dot_dimension_numbers<[1], [0], [0], [1], [0, 0, 1, 1], [], []>} : vector<8x36xbf16>, vector<36x8xbf16>, vector<8x8xf32> -> vector<8x8xf32>
    %148 = vector.broadcast %29 : vector<1x8xf32> to vector<8x8xf32>
    %149 = arith.addf %147, %148 : vector<8x8xf32>
    %cst_87 = arith.constant 0.00999999977 : f32
    %150 = vector.broadcast %cst_87 : f32 to vector<8x8xf32>
    %151 = arith.mulf %150, %149 : vector<8x8xf32>
    %152 = arith.maximumf %149, %151 : vector<8x8xf32>
    %c0_88 = arith.constant 0 : index
    %c48 = arith.constant 48 : index
    %c0_89 = arith.constant 0 : index
    %153 = vector.load %arg2[%c0_88, %c48, %c0_89] : memref<1x64x4xbf16, #tpu.memory_space<vmem>>, vector<1x8x4xbf16>
    %154 = vector.shape_cast %153 : vector<1x8x4xbf16> to vector<8x4xbf16>
    %cst_90 = arith.constant dense<0.000000e+00> : vector<8x8xf32>
    %155 = tpu.matmul %154, %28, %cst_90 {dimension_numbers = #tpu.dot_dimension_numbers<[1], [0], [0], [1], [0, 0, 1, 1], [], []>} : vector<8x4xbf16>, vector<4x8xbf16>, vector<8x8xf32> -> vector<8x8xf32>
    %156 = vector.broadcast %30 : vector<1x8xf32> to vector<8x8xf32>
    %157 = arith.addf %155, %156 : vector<8x8xf32>
    %158 = arith.addf %152, %157 : vector<8x8xf32>
    %cst_91 = arith.constant 0.707106769 : f32
    %159 = vector.broadcast %cst_91 : f32 to vector<8x8xf32>
    %160 = arith.mulf %158, %159 : vector<8x8xf32>
    %c0_92 = arith.constant 0 : index
    %c48_93 = arith.constant 48 : index
    %c0_94 = arith.constant 0 : index
    %161 = vector.load %arg8[%c0_92, %c48_93, %c0_94] : memref<1x64x8xf32, #tpu.memory_space<vmem>>, vector<1x8x8xf32>
    %162 = vector.shape_cast %161 : vector<1x8x8xf32> to vector<8x8xf32>
    %163 = vector.shape_cast %160 : vector<8x8xf32> to vector<1x8x8xf32>
    tpu.vector_store %arg8[%c0_92, %c48_93, %c0_94], %163 {strides = array<i32>} : memref<1x64x8xf32, #tpu.memory_space<vmem>>, vector<1x8x8xf32>,
    %c271 = arith.constant 271 : index
    %c0_95 = arith.constant 0 : index
    %164 = tpu.strided_load %arg9[%c271, %c0_95] {strides = array<i32: 2, 1>} : memref<328x36xf32, #tpu.memory_space<vmem>>, vector<8x36xf32>
    %165 = arith.truncf %164 : vector<8x36xf32> to vector<8x36xbf16>
    %cst_96 = arith.constant dense<0.000000e+00> : vector<8x8xf32>
    %166 = tpu.matmul %165, %27, %cst_96 {dimension_numbers = #tpu.dot_dimension_numbers<[1], [0], [0], [1], [0, 0, 1, 1], [], []>} : vector<8x36xbf16>, vector<36x8xbf16>, vector<8x8xf32> -> vector<8x8xf32>
    %167 = vector.broadcast %29 : vector<1x8xf32> to vector<8x8xf32>
    %168 = arith.addf %166, %167 : vector<8x8xf32>
    %cst_97 = arith.constant 0.00999999977 : f32
    %169 = vector.broadcast %cst_97 : f32 to vector<8x8xf32>
    %170 = arith.mulf %169, %168 : vector<8x8xf32>
    %171 = arith.maximumf %168, %170 : vector<8x8xf32>
    %c0_98 = arith.constant 0 : index
    %c56 = arith.constant 56 : index
    %c0_99 = arith.constant 0 : index
    %172 = vector.load %arg2[%c0_98, %c56, %c0_99] : memref<1x64x4xbf16, #tpu.memory_space<vmem>>, vector<1x8x4xbf16>
    %173 = vector.shape_cast %172 : vector<1x8x4xbf16> to vector<8x4xbf16>
    %cst_100 = arith.constant dense<0.000000e+00> : vector<8x8xf32>
    %174 = tpu.matmul %173, %28, %cst_100 {dimension_numbers = #tpu.dot_dimension_numbers<[1], [0], [0], [1], [0, 0, 1, 1], [], []>} : vector<8x4xbf16>, vector<4x8xbf16>, vector<8x8xf32> -> vector<8x8xf32>
    %175 = vector.broadcast %30 : vector<1x8xf32> to vector<8x8xf32>
    %176 = arith.addf %174, %175 : vector<8x8xf32>
    %177 = arith.addf %171, %176 : vector<8x8xf32>
    %cst_101 = arith.constant 0.707106769 : f32
    %178 = vector.broadcast %cst_101 : f32 to vector<8x8xf32>
    %179 = arith.mulf %177, %178 : vector<8x8xf32>
    %c0_102 = arith.constant 0 : index
    %c56_103 = arith.constant 56 : index
    %c0_104 = arith.constant 0 : index
    %180 = vector.load %arg8[%c0_102, %c56_103, %c0_104] : memref<1x64x8xf32, #tpu.memory_space<vmem>>, vector<1x8x8xf32>
    %181 = vector.shape_cast %180 : vector<1x8x8xf32> to vector<8x8xf32>
    %182 = vector.shape_cast %179 : vector<8x8xf32> to vector<1x8x8xf32>
    tpu.vector_store %arg8[%c0_102, %c56_103, %c0_104], %182 {strides = array<i32>} : memref<1x64x8xf32, #tpu.memory_space<vmem>>, vector<1x8x8xf32>,
    return
  }
  func.func @transform_0(%arg0: i32) -> (i32, i32, i32) {
    %c0_i32 = arith.constant 0 : i32
    %c0_i32_0 = arith.constant 0 : i32
    %c0_i32_1 = arith.constant 0 : i32
    return %arg0, %c0_i32, %c0_i32_0 : i32, i32, i32
  }
  func.func @transform_1(%arg0: i32) -> (i32, i32, i32) {
    %c0_i32 = arith.constant 0 : i32
    %c0_i32_0 = arith.constant 0 : i32
    %c0_i32_1 = arith.constant 0 : i32
    return %arg0, %c0_i32, %c0_i32_0 : i32, i32, i32
  }
  func.func @transform_2(%arg0: i32) -> (i32, i32) {
    %c0_i32 = arith.constant 0 : i32
    %c0_i32_0 = arith.constant 0 : i32
    %c0_i32_1 = arith.constant 0 : i32
    return %c0_i32, %c0_i32_0 : i32, i32
  }
  func.func @transform_3(%arg0: i32) -> (i32, i32) {
    %c0_i32 = arith.constant 0 : i32
    %c0_i32_0 = arith.constant 0 : i32
    %c0_i32_1 = arith.constant 0 : i32
    return %c0_i32, %c0_i32_0 : i32, i32
  }
  func.func @transform_4(%arg0: i32) -> (i32, i32) {
    %c0_i32 = arith.constant 0 : i32
    %c0_i32_0 = arith.constant 0 : i32
    %c0_i32_1 = arith.constant 0 : i32
    return %c0_i32, %c0_i32_0 : i32, i32
  }
  func.func @transform_5(%arg0: i32) -> (i32, i32) {
    %c0_i32 = arith.constant 0 : i32
    %c0_i32_0 = arith.constant 0 : i32
    %c0_i32_1 = arith.constant 0 : i32
    return %c0_i32, %c0_i32_0 : i32, i32
  }
  func.func @transform_6(%arg0: i32) -> (i32, i32) {
    %c0_i32 = arith.constant 0 : i32
    %c0_i32_0 = arith.constant 0 : i32
    %c0_i32_1 = arith.constant 0 : i32
    return %c0_i32, %c0_i32_0 : i32, i32
  }
  func.func @transform_7(%arg0: i32) -> (i32, i32, i32) {
    %c0_i32 = arith.constant 0 : i32
    %c0_i32_0 = arith.constant 0 : i32
    %c0_i32_1 = arith.constant 0 : i32
    return %arg0, %c0_i32, %c0_i32_0 : i32, i32, i32
  }
}

</mosaic_0001>

<bundles_post_ra>
// kernel: resblock_pallas.1
= control target key start
LH: loop header
LB: loop body
LE: loop exit
PB: predicated region body
PF: predicated region fallthrough
CT: control target
= control target key end

     0   :  { %12 = vsyncpa [#allocation4], 0  ;;  %s2330_s0 = inlined_call_operand.vmem [shape: bf16[2,288,40], index: 0, kind: input, shape index: {}]   ;;  %s2331_s1 = inlined_call_operand.vmem [shape: bf16[2,64,4], index: 1, kind: input, shape index: {}]   ;;  %s2332_s2 = inlined_call_operand.vmem [shape: bf16[40,36], index: 2, kind: input, shape index: {}]   ;;  %s2333_s3 = inlined_call_operand.vmem [shape: bf16[36,8], index: 3, kind: input, shape index: {}]   ;;  %s2334_s4 = inlined_call_operand.vmem [shape: f32[1,8], index: 4, kind: input, shape index: {}]   ;;  %s2335_s5 = inlined_call_operand.vmem [shape: bf16[4,8], index: 5, kind: input, shape index: {}]   ;;  %s2336_s6 = inlined_call_operand.vmem [shape: f32[1,8], index: 6, kind: input, shape index: {}]   ;;  %s2337_s7 = inlined_call_operand.hbm [shape: f32[2,64,8], index: 7, kind: output, shape index: {}]  }
   0x1   :  { %14 = vsyncpa [#allocation4 + $0x1], 0  ;;  %s1788_s24 = smov 0   ;;  %s1790_s25 = smov 0  }
   0x2   :  { %s1792_s26 = smov 0   ;;  %s1794_s27 = smov 0  }
   0x3 LB: > { %s1809_s28 = sadd.s32 4294967295, %s1743_s27   ;;  %s1468_s29 = sadd.s32 4294967294, %s1743_s27   ;;  %s1743_s27 = sphi %s1794_s27, %s2343_s27   ;;  %s1739_s26 = sphi %s1792_s26, %s2342_s26   ;;  %s1735_s25 = sphi %s1790_s25, %s2341_s25   ;;  %s1731_s24 = sphi %s1788_s24, %s2340_s24  }
   0x4   : > { %s1813_s30 = sadd.s32 1, %s1743_s27   ;;  %s184_s8 = sadd.s32 1, %s1739_s26 }
   0x5   : > { %s181_s9 = ssub.s32 %s1743_s27, %s1813_s30  ;;  %p194_p0 = scmp.ne.s32.totalorder %s1739_s26, %s1735_s25 }
   0x6   : > { %p182_p1 = scmp.eq.s32.totalorder %s181_s9, 0  ;;  %p195_p2 = scmp.eq.s32.totalorder %s1809_s28, 1 }
   0x7   : > { %p200_p3 = scmp.ne.s32.totalorder %s1735_s25, %s1731_s24  ;;  %p201_p4 = scmp.eq.s32.totalorder %s1468_s29, 1 }
   0x8   : > { %s1824_s10 = scalar_select %p182_p1, %s1739_s26, %s184_s8  }
   0x9   : > { %p1826_p5 = por %p195_p2, %p194_p0  ;;  %p1830_p6 = por %p201_p4, %p200_p3 }
   0xa   : > { %p1471_p7 = scmp.ge.s32.totalorder %s1743_s27, 1  ;;  %p250_p8 = scmp.lt.s32.totalorder %s1743_s27, 3 }
   0xc   : > { %p251_p9 = pnand %p1471_p7, %p250_p8 }
   0xd   : > { %p287_p10 = scmp.lt.s32.totalorder (!%p251_p9), %s1809_s28, 1  ;;  %s1626_s16 = sshll.u32 (!%p251_p9), %s1809_s28, 6 }
   0xe   : > { %254 = sbr.rel (%p251_p9) target bundleno = 544 (0x220), region = 48  ;;  %s1390_s19 = scalar_lea.hbm (!%p251_p9), %s2337_s7, %s1626_s16 }
   0xf   : > { %s1701_s8 = scalar_lea.hbm (!%p251_p9), %s2337_s7, 128 }
  0x13   : > { %v344_v0 = vld [vmem:[%s2332_s2 + $0x10] sm:$0xf]  ;;  %vm505_vm0 = vcmask 1043456   ;;  %s1841_s15 = scalar_select %p287_p10, %s1809_s28, 1  ;;  %v1623_v4 = vld [vmem:[%s2332_s2 + $0x8] sm:$0xff]  ;;  %v1622_v5 = vld [vmem:[%s2332_s2] sm:$0xff] }
  0x14   : > { %v444_v1 = vunpack.c.l.b16 %v344_v0  ;;  %vm450_vm1 = vcmask 326656   ;;  %vm298_vm2 = vcmask 293888   ;;  %v1745_v21 = vmov 0.0   ;;  %v1017_v26 = vld [vmem:[%s2333_s3 + $0x10] sm:$0x3]  ;;  %v1909_v35 = vld [vmem:[%s2333_s3 + $0x8] sm:$0xff] }
  0x15   : > { %s1636_s18 = smul.u32 144, %s1841_s15  ;;  %301 = vst.msk [vmem:[#allocation2 + $0x10] sm:$0xff] %vm298_vm2, %v1745_v21  ;;  %v1036_v28 = vunpack.c.l.b16 %v1017_v26  ;;  %vm680_vm3 = vcmask 31744   ;;  %vm717_vm4 = vcmask 64544   ;;  %vm754_vm5 = vcmask 97344   ;;  %s1603_s9 = sshll.u32 %s1841_s15, 5 }
  0x16   : > { %v447_v2 = vpack.c.b16 %v444_v1, %v444_v1  ;;  %302 = vst.msk [vmem:[#allocation2 + $0x18] sm:$0xff] %vm298_vm2, %v1745_v21  ;;  %vm1045_vm6 = vcmask 1041408   ;;  %vm791_vm7 = vcmask 130144   ;;  %vm828_vm8 = vcmask 162944   ;;  %v1018_v36 = vld [vmem:[%s2335_s5] sm:$0x3]  ;;  %s1918_s20 = scalar_lea.vmem %s2331_s1, %s1603_s9 }
  0x17   : > { %s1853_s23 = scalar_lea.vmem %s2330_s0, %s1636_s18  ;;  %303 = vst.msk [vmem:[#allocation2 + $0x20] sm:$0xff] %vm298_vm2, %v1745_v21  ;;  %v1039_v30 = vpack.c.b16 %v1036_v28, %v1036_v28  ;;  %vm865_vm9 = vcmask 195744   ;;  %vm902_vm10 = vcmask 228544   ;;  %vm939_vm11 = vcmask 261344   ;;  %v1928_v38 = vld [vmem:[%s2333_s3] sm:$0xff]  ;;  %s284_s9 = sand.u32 1, %s1735_s25  }
  0x18   : > { %v507_v3 = vsel %vm505_vm0, %v447_v2, 0  ;;  %v1604_v6 = vld [vmem:[%s1853_s23] sm:$0xff]  ;;  %v1605_v7 = vld [vmem:[%s1853_s23 + $0x8] sm:$0xff]  ;;  %v1606_v9 = vld [vmem:[%s1853_s23 + $0x10] sm:$0xff]  ;;  %v1922_v37 = vsel %vm1045_vm6, %v1018_v36, 0  ;;  %vm976_vm12 = vcmask 294144  }
  0x19   : > { %514 = vmatpush.bf16.msra.mxu0 %v507_v3  ;;  %1627 = vmatpush.bf16.msra.mxu1 %v507_v3  ;;  %v1613_v8 = vld [vmem:[%s1853_s23 + $0x48] sm:$0xff]  ;;  %v1614_v10 = vld [vmem:[%s1853_s23 + $0x50] sm:$0xff]  ;;  %v1607_v11 = vld [vmem:[%s1853_s23 + $0x18] sm:$0xff]  ;;  %v1898_v31 = vsel %vm1045_vm6, %v1039_v30, 0  ;;  %s1472_s13 = sshll.u32 %s284_s9, 6  ;;  %vm1089_vm13 = vcmask 64512  }
  0x1a   : > { %1629 = vmatpush.bf16.msra.mxu3 %v507_v3  ;;  %1628 = vmatpush.bf16.msra.mxu2 %v507_v3  ;;  %v1615_v12 = vld [vmem:[%s1853_s23 + $0x58] sm:$0xff]  ;;  %v1618_v13 = vld [vmem:[%s1853_s23 + $0x70] sm:$0xff]  ;;  %v1608_v14 = vld [vmem:[%s1853_s23 + $0x20] sm:$0xff]  ;;  %s2261_s14 = scalar_lea.vmem [#allocation3], %s1472_s13  ;;  %s1393_s15 = sshll.u32 %s1390_s19, 4  ;;  %s1394_s15 = int_to_ptr.hbm [resolvable:$true] %s1393_s15 }
  0x1b   : > { %v1617_v15 = vld [vmem:[%s1853_s23 + $0x68] sm:$0xff]  ;;  %v1616_v16 = vld [vmem:[%s1853_s23 + $0x60] sm:$0xff]  ;;  %v1619_v17 = vld [vmem:[%s1853_s23 + $0x78] sm:$0xff]  ;;  %s1379_s28 = scalar_lea.sflag [#allocation4], %s284_s9  ;;  %s1695_s21 = sshra.s32 %s1394_s15, 4  ;;  %s1696_s21 = int_to_ptr.hbm [resolvable:$true] %s1695_s21 }
  0x1c   : > { %v1609_v18 = vld [vmem:[%s1853_s23 + $0x28] sm:$0xff]  ;;  %v1620_v19 = vld [vmem:[%s1853_s23 + $0x80] sm:$0xff]  ;;  %v1610_v20 = vld [vmem:[%s1853_s23 + $0x30] sm:$0xff]  ;;  %s1697_s22 = scalar_lea.hbm %s1696_s21, 64  ;;  %p1702_p0 = scmp.lt.s32.totalorder %s1696_s21, %s2337_s7 }
  0x1d   : > { %515 = vmatpush.bf16.msra.mxu0 %v1623_v4  ;;  %1630 = vmatpush.bf16.msra.mxu1 %v1623_v4  ;;  %v1621_v22 = vld [vmem:[%s1853_s23 + $0x88] sm:$0xff]  ;;  %v1611_v23 = vld [vmem:[%s1853_s23 + $0x38] sm:$0xff]  ;;  %v1612_v24 = vld [vmem:[%s1853_s23 + $0x40] sm:$0xff]  ;;  %p1698_p11 = scmp.ne.s32.totalorder %s1696_s21, %s1697_s22  ;;  %p1703_p1 = scmp.lt.s32.totalorder %s1701_s8, %s1697_s22 }
  0x1e   : > { %1632 = vmatpush.bf16.msra.mxu3 %v1623_v4  ;;  %1631 = vmatpush.bf16.msra.mxu2 %v1623_v4  ;;  %v1064_v40 = vld [vmem:[%s1918_s20] sm:$0xf] }
  0x1f   : > { %p1699_p12 = pnand %p1698_p11, %p1826_p5  ;;  %p1704_p2 = por %p1703_p1, %p1702_p0 }
  0x21   : > { %516 = vmatpush.bf16.msra.mxu0 %v1622_v5  ;;  %1633 = vmatpush.bf16.msra.mxu1 %v1622_v5  ;;  %p1700_p13 = pneg %p1699_p12 }
  0x22   : > { %1635 = vmatpush.bf16.msra.mxu3 %v1622_v5  ;;  %1634 = vmatpush.bf16.msra.mxu2 %v1622_v5  ;;  %v1112_v5 = vld [vmem:[%s1918_s20 + $0x4] sm:$0xf] }
  0x23   : > { %p1705_p3 = pnand %p1704_p2, %p1700_p13 }
  0x24   : > { %1556 = vmatmul.msk.bf16.vlgmr.msra.gmra.mxu0 %vm450_vm1, %v1604_v6  ;;  %1565 = vmatmul.msk.bf16.vlgmr.msra.gmra.mxu1 %vm450_vm1, %v1613_v8 }
  0x25   : > { %1570 = vmatmul.msk.bf16.vlgmr.msra.gmra.mxu3 %vm450_vm1, %v1618_v13  ;;  %1569 = vmatmul.msk.bf16.vlgmr.msra.gmra.mxu2 %vm450_vm1, %v1617_v15 }
  0x26   : > { %1054 = vmatpush.bf16.msrb.mxu1 %v1898_v31  ;;  %1102 = vmatpush.bf16.msrb.mxu3 %v1898_v31 }
  0x27   : > { %1081 = vmatpush.bf16.msrb.mxu2 %v1922_v37 }
  0x2a   : > { %1055 = vmatpush.bf16.msrb.mxu1 %v1909_v35  ;;  %1103 = vmatpush.bf16.msrb.mxu3 %v1909_v35 }
  0x2b   : > { %1123 = vmatpush.bf16.msra.mxu2 %v1922_v37 }
  0x2e   : > { %1056 = vmatpush.bf16.msrb.mxu1 %v1928_v38  ;;  %1104 = vmatpush.bf16.msrb.mxu3 %v1928_v38 }
  0x32   : > { %1143 = vmatpush.bf16.msra.mxu1 %v1898_v31  ;;  %1164 = vmatpush.bf16.msra.mxu3 %v1922_v37 }
  0x34   : > { %1557 = vmatmul.msk.bf16.gmra.mxu0 %vm450_vm1, %v1605_v7  ;;  %1566 = vmatmul.msk.bf16.gmra.mxu1 %vm450_vm1, %v1614_v10 }
  0x35   : > { %1571 = vmatmul.msk.bf16.gmra.mxu3 %vm450_vm1, %v1619_v17  ;;  %1583 = vmatmul.msk.bf16.vlgmr.msrb.gmra.mxu2 %vm680_vm3, %v1064_v40 }
  0x36   : > { %1184 = vmatpush.bf16.msrb.mxu2 %v1898_v31  ;;  %1144 = vmatpush.bf16.msra.mxu1 %v1909_v35 }
  0x3a   : > { %1185 = vmatpush.bf16.msrb.mxu2 %v1909_v35  ;;  %1145 = vmatpush.bf16.msra.mxu1 %v1928_v38 }
  0x3e   : > { %1186 = vmatpush.bf16.msrb.mxu2 %v1928_v38 }
  0x44   : > { %1558 = vmatmul.msk.bf16.gmra.mxu0 %vm450_vm1, %v1606_v9  ;;  %1567 = vmatmul.msk.bf16.gmra.mxu1 %vm450_vm1, %v1615_v12 }
  0x45   : > { %1572 = vmatmul.msk.bf16.gmra.mxu3 %vm450_vm1, %v1620_v19  ;;  %1585 = vmatmul.msk.bf16.vlgmr.msra.gmra.mxu2 %vm680_vm3, %v1112_v5 }
  0x46   : > { %1246 = vmatpush.bf16.msra.mxu2 %v1922_v37 }
  0x54   : > { %1559 = vmatmul.msk.bf16.gmra.mxu0 %vm450_vm1, %v1607_v11  ;;  %1568 = vmatmul.msk.bf16.gmra.mxu1 %vm450_vm1, %v1616_v16 }
  0x55   : > { %1573 = vmatmul.msk.bf16.gmra.mxu3 %vm450_vm1, %v1621_v22 }
  0x64   : > { %1560 = vmatmul.msk.bf16.gmra.mxu0 %vm450_vm1, %v1608_v14 }
  0x74   : > { %1561 = vmatmul.msk.bf16.gmra.mxu0 %vm450_vm1, %v1609_v18 }
  0x84   : > { %1562 = vmatmul.msk.bf16.gmra.mxu0 %vm450_vm1, %v1610_v20 }
  0x94   : > { %1563 = vmatmul.msk.bf16.gmra.mxu0 %vm450_vm1, %v1611_v23 }
  0xa1   : > { %v518_v25 = vpop.f32.mrf.mxu0  ;;  %v563_v60 = vpop.f32.mrf.mxu1 }
  0xa2   : > { %v608_v27 = vmul.f32 0.01, %v518_v25  ;;  %v626_v61 = vmul.f32 0.01, %v563_v60 }
  0xa4   : > { %v644_v29 = vmax.f32 %v518_v25, %v608_v27  ;;  %1564 = vmatmul.msk.bf16.gmra.mxu0 %vm450_vm1, %v1612_v24  ;;  %v1979_v0 = vmax.f32 %v563_v60, %v626_v61  ;;  %v1153_v60 = vld [vmem:[%s1918_s20 + $0x8] sm:$0xf] }
  0xa6   : > { %792 = vst.msk [vmem:[#allocation2 + $0x14] sm:$0xff] %vm791_vm7, %v644_v29 }
  0xa7   : > { %829 = vst.msk [vmem:[#allocation2 + $0x13] sm:$0xff] %vm828_vm8, %v644_v29 }
  0xa8   : > { %866 = vst.msk [vmem:[#allocation2 + $0x12] sm:$0xff] %vm865_vm9, %v644_v29  ;;  %v588_v30 = vpop.f32.mrf.mxu3 }
  0xa9   : > { %v520_v32 = vpop.f32.mrf.mxu0  ;;  %v565_v2 = vpop.f32.mrf.mxu1 }
  0xaa   : > { %v609_v33 = vmul.f32 0.01, %v520_v32  ;;  %v627_v4 = vmul.f32 0.01, %v565_v2 }
  0xac   : > { %v645_v34 = vmax.f32 %v520_v32, %v609_v33  ;;  %v1993_v7 = vmax.f32 %v565_v2, %v627_v4  ;;  %v636_v33 = vmul.f32 0.01, %v588_v30 }
  0xae   : > { %793 = vst.msk [vmem:[#allocation2 + $0x1c] sm:$0xff] %vm791_vm7, %v645_v34 }
  0xaf   : > { %830 = vst.msk [vmem:[#allocation2 + $0x1b] sm:$0xff] %vm828_vm8, %v645_v34 }
  0xb0   : > { %867 = vst.msk [vmem:[#allocation2 + $0x1a] sm:$0xff] %vm865_vm9, %v645_v34 }
  0xb1   : > { %v523_v39 = vpop.f32.mrf.mxu0  ;;  %v568_v9 = vpop.f32.mrf.mxu1 }
  0xb2   : > { %v610_v41 = vmul.f32 0.01, %v523_v39  ;;  %v628_v10 = vmul.f32 0.01, %v568_v9 }
  0xb4   : > { %v646_v42 = vmax.f32 %v523_v39, %v610_v41  ;;  %v2001_v14 = vmax.f32 %v568_v9, %v628_v10  ;;  %v2045_v39 = vmax.f32 %v588_v30, %v636_v33 }
  0xb6   : > { %683 = vst.msk [vmem:[#allocation2 + $0x36] sm:$0xff] %vm680_vm3, %v646_v42 }
  0xb7   : > { %720 = vst.msk [vmem:[#allocation2 + $0x35] sm:$0xff] %vm717_vm4, %v646_v42 }
  0xb8   : > { %905 = vst.msk [vmem:[#allocation2 + $0x12] sm:$0xff] %vm902_vm10, %v646_v42 }
  0xb9   : > { %v525_v43 = vpop.f32.mrf.mxu0  ;;  %942 = vst.msk [vmem:[#allocation2 + $0x11] sm:$0xff] %vm939_vm11, %v646_v42  ;;  %v570_v17 = vpop.f32.mrf.mxu1 }
  0xba   : > { %v611_v44 = vmul.f32 0.01, %v525_v43  ;;  %979 = vst.msk [vmem:[#allocation2 + $0x10] sm:$0xff] %vm976_vm12, %v646_v42  ;;  %v629_v18 = vmul.f32 0.01, %v570_v17 }
  0xbb   : > { %757 = vst.msk [vmem:[#allocation2 + $0x34] sm:$0xff] %vm754_vm5, %v646_v42  ;;  %v590_v42 = vpop.f32.mrf.mxu3 }
  0xbc   : > { %v647_v45 = vmax.f32 %v525_v43, %v611_v44  ;;  %701 = vst.msk [vmem:[#allocation2 + $0xc6] sm:$0xff] %vm680_vm3, %v2001_v14  ;;  %v2016_v21 = vmax.f32 %v570_v17, %v629_v18  ;;  %v637_v44 = vmul.f32 0.01, %v590_v42 }
  0xbd   : > { %738 = vst.msk [vmem:[#allocation2 + $0xc5] sm:$0xff] %vm717_vm4, %v2001_v14 }
  0xbe   : > { %684 = vst.msk [vmem:[#allocation2 + $0x3e] sm:$0xff] %vm680_vm3, %v647_v45 }
  0xbf   : > { %721 = vst.msk [vmem:[#allocation2 + $0x3d] sm:$0xff] %vm717_vm4, %v647_v45 }
  0xc0   : > { %758 = vst.msk [vmem:[#allocation2 + $0x3c] sm:$0xff] %vm754_vm5, %v647_v45 }
  0xc1   : > { %v528_v46 = vpop.f32.mrf.mxu0  ;;  %906 = vst.msk [vmem:[#allocation2 + $0x1a] sm:$0xff] %vm902_vm10, %v647_v45  ;;  %v573_v23 = vpop.f32.mrf.mxu1 }
  0xc2   : > { %v612_v47 = vmul.f32 0.01, %v528_v46  ;;  %943 = vst.msk [vmem:[#allocation2 + $0x19] sm:$0xff] %vm939_vm11, %v647_v45  ;;  %v630_v24 = vmul.f32 0.01, %v573_v23 }
  0xc3   : > { %980 = vst.msk [vmem:[#allocation2 + $0x18] sm:$0xff] %vm976_vm12, %v647_v45 }
  0xc4   : > { %v648_v48 = vmax.f32 %v528_v46, %v612_v47  ;;  %775 = vst.msk [vmem:[#allocation2 + $0xc4] sm:$0xff] %vm754_vm5, %v2001_v14  ;;  %v2027_v26 = vmax.f32 %v573_v23, %v630_v24  ;;  %v2058_v46 = vmax.f32 %v590_v42, %v637_v44 }
  0xc5   : > { %702 = vst.msk [vmem:[#allocation2 + $0xce] sm:$0xff] %vm680_vm3, %v2016_v21 }
  0xc6   : > { %722 = vst.msk [vmem:[#allocation2 + $0x45] sm:$0xff] %vm717_vm4, %v648_v48 }
  0xc7   : > { %759 = vst.msk [vmem:[#allocation2 + $0x44] sm:$0xff] %vm754_vm5, %v648_v48 }
  0xc8   : > { %944 = vst.msk [vmem:[#allocation2 + $0x21] sm:$0xff] %vm939_vm11, %v648_v48 }
  0xc9   : > { %v530_v49 = vpop.f32.mrf.mxu0  ;;  %981 = vst.msk [vmem:[#allocation2 + $0x20] sm:$0xff] %vm976_vm12, %v648_v48  ;;  %v575_v29 = vpop.f32.mrf.mxu1 }
  0xca   : > { %v613_v50 = vmul.f32 0.01, %v530_v49  ;;  %796 = vst.msk [vmem:[#allocation2 + $0x34] sm:$0xff] %vm791_vm7, %v648_v48  ;;  %v631_v32 = vmul.f32 0.01, %v575_v29 }
  0xcb   : > { %833 = vst.msk [vmem:[#allocation2 + $0x33] sm:$0xff] %vm828_vm8, %v648_v48 }
  0xcc   : > { %v649_v51 = vmax.f32 %v530_v49, %v613_v50  ;;  %870 = vst.msk [vmem:[#allocation2 + $0x32] sm:$0xff] %vm865_vm9, %v648_v48  ;;  %v2042_v36 = vmax.f32 %v575_v29, %v631_v32  ;;  %v583_v48 = vpop.f32.mrf.mxu2  ;;  %v2225_v32 = vld [vmem:[%s2334_s4] ss:$0 sm:$0xff] }
  0xcd   : > { %739 = vst.msk [vmem:[#allocation2 + $0xcd] sm:$0xff] %vm717_vm4, %v2016_v21  ;;  %v634_v49 = vmul.f32 0.01, %v583_v48 }
  0xce   : > { %797 = vst.msk [vmem:[#allocation2 + $0x3c] sm:$0xff] %vm791_vm7, %v649_v51 }
  0xcf   : > { %834 = vst.msk [vmem:[#allocation2 + $0x3b] sm:$0xff] %vm828_vm8, %v649_v51 }
  0xd0   : > { %v1022_v57 = vld [vmem:[#allocation2 + $0x13] ss:$2 sm:$0xff]  ;;  %871 = vst.msk [vmem:[#allocation2 + $0x3a] sm:$0xff] %vm865_vm9, %v649_v51 }
  0xd1   : > { %v533_v52 = vpop.f32.mrf.mxu0  ;;  %v1023_v58 = vpack.c.bf16 %v1022_v57, %v1022_v57  ;;  %776 = vst.msk [vmem:[#allocation2 + $0xcc] sm:$0xff] %vm754_vm5, %v2016_v21  ;;  %v578_v43 = vpop.f32.mrf.mxu1 }
  0xd2   : > { %v614_v53 = vmul.f32 0.01, %v533_v52  ;;  %740 = vst.msk [vmem:[#allocation2 + $0xd5] sm:$0xff] %vm717_vm4, %v2027_v26  ;;  %v632_v45 = vmul.f32 0.01, %v578_v43 }
  0xd3   : > { %1582 = vmatmul.msk.bf16.vlgmr.msrb.gmra.mxu1 %vm298_vm2, %v1023_v58  ;;  %777 = vst.msk [vmem:[#allocation2 + $0xd4] sm:$0xff] %vm754_vm5, %v2027_v26 }
  0xd4   : > { %v650_v54 = vmax.f32 %v533_v52, %v614_v53  ;;  %1205 = vmatpush.bf16.msrb.mxu1 %v1922_v37  ;;  %814 = vst.msk [vmem:[#allocation2 + $0xc4] sm:$0xff] %vm791_vm7, %v2027_v26  ;;  %v2060_v47 = vmax.f32 %v578_v43, %v632_v45  ;;  %v2073_v52 = vmax.f32 %v583_v48, %v634_v49  ;;  %v585_v61 = vpop.f32.mrf.mxu2 }
  0xd5   : > { %815 = vst.msk [vmem:[#allocation2 + $0xcc] sm:$0xff] %vm791_vm7, %v2042_v36 }
  0xd6   : > { %687 = vst.msk [vmem:[#allocation2 + $0x56] sm:$0xff] %vm680_vm3, %v650_v54 }
  0xd7   : > { %724 = vst.msk [vmem:[#allocation2 + $0x55] sm:$0xff] %vm717_vm4, %v650_v54 }
  0xd8   : > { %761 = vst.msk [vmem:[#allocation2 + $0x54] sm:$0xff] %vm754_vm5, %v650_v54 }
  0xd9   : > { %798 = vst.msk [vmem:[#allocation2 + $0x44] sm:$0xff] %vm791_vm7, %v650_v54  ;;  %v535_v55 = vpop.f32.mrf.mxu0 }
  0xda   : > { %835 = vst.msk [vmem:[#allocation2 + $0x43] sm:$0xff] %vm828_vm8, %v650_v54  ;;  %v615_v56 = vmul.f32 0.01, %v535_v55 }
  0xdb   : > { %909 = vst.msk [vmem:[#allocation2 + $0x32] sm:$0xff] %vm902_vm10, %v650_v54 }
  0xdc   : > { %v651_v59 = vmax.f32 %v535_v55, %v615_v56  ;;  %872 = vst.msk [vmem:[#allocation2 + $0x42] sm:$0xff] %vm865_vm9, %v650_v54  ;;  %v593_v55 = vpop.f32.mrf.mxu3 }
  0xdd   : > { %946 = vst.msk [vmem:[#allocation2 + $0x31] sm:$0xff] %vm939_vm11, %v650_v54  ;;  %v638_v56 = vmul.f32 0.01, %v593_v55 }
  0xde   : > { %688 = vst.msk [vmem:[#allocation2 + $0x5e] sm:$0xff] %vm680_vm3, %v651_v59 }
  0xdf   : > { %725 = vst.msk [vmem:[#allocation2 + $0x5d] sm:$0xff] %vm717_vm4, %v651_v59  ;;  %v674_v58 = vmax.f32 %v593_v55, %v638_v56 }
  0xe0   : > { %762 = vst.msk [vmem:[#allocation2 + $0x5c] sm:$0xff] %vm754_vm5, %v651_v59 }
  0xe1   : > { %v538_v62 = vpop.f32.mrf.mxu0  ;;  %910 = vst.msk [vmem:[#allocation2 + $0x3a] sm:$0xff] %vm902_vm10, %v651_v59 }
  0xe2   : > { %v616_v63 = vmul.f32 0.01, %v538_v62  ;;  %947 = vst.msk [vmem:[#allocation2 + $0x39] sm:$0xff] %vm939_vm11, %v651_v59 }
  0xe3   : > { %983 = vst.msk [vmem:[#allocation2 + $0x30] sm:$0xff] %vm976_vm12, %v650_v54  ;;  %v580_v54 = vpop.f32.mrf.mxu1 }
  0xe4   : > { %v652_v1 = vmax.f32 %v538_v62, %v616_v63  ;;  %984 = vst.msk [vmem:[#allocation2 + $0x38] sm:$0xff] %vm976_vm12, %v651_v59  ;;  %v633_v57 = vmul.f32 0.01, %v580_v54  ;;  %v635_v62 = vmul.f32 0.01, %v585_v61 }
  0xe5   : > { %852 = vst.msk [vmem:[#allocation2 + $0xcb] sm:$0xff] %vm828_vm8, %v2042_v36 }
  0xe6   : > { %689 = vst.msk [vmem:[#allocation2 + $0x66] sm:$0xff] %vm680_vm3, %v652_v1  ;;  %v2090_v59 = vmax.f32 %v580_v54, %v633_v57  ;;  %v671_v63 = vmax.f32 %v585_v61, %v635_v62 }
  0xe7   : > { %726 = vst.msk [vmem:[#allocation2 + $0x65] sm:$0xff] %vm717_vm4, %v652_v1 }
  0xe8   : > { %763 = vst.msk [vmem:[#allocation2 + $0x64] sm:$0xff] %vm754_vm5, %v652_v1 }
  0xe9   : > { %v540_v3 = vpop.f32.mrf.mxu0  ;;  %800 = vst.msk [vmem:[#allocation2 + $0x54] sm:$0xff] %vm791_vm7, %v652_v1 }
  0xea   : > { %v617_v6 = vmul.f32 0.01, %v540_v3  ;;  %911 = vst.msk [vmem:[#allocation2 + $0x42] sm:$0xff] %vm902_vm10, %v652_v1 }
  0xeb   : > { %948 = vst.msk [vmem:[#allocation2 + $0x41] sm:$0xff] %vm939_vm11, %v652_v1 }
  0xec   : > { %v653_v8 = vmax.f32 %v540_v3, %v617_v6  ;;  %985 = vst.msk [vmem:[#allocation2 + $0x40] sm:$0xff] %vm976_vm12, %v652_v1  ;;  %v595_v6 = vpop.f32.mrf.mxu3 }
  0xed   : > { %710 = vst.msk [vmem:[#allocation2 + $0x10e] sm:$0xff] %vm680_vm3, %v2058_v46 }
  0xee   : > { %801 = vst.msk [vmem:[#allocation2 + $0x5c] sm:$0xff] %vm791_vm7, %v653_v8 }
  0xef   : > { %838 = vst.msk [vmem:[#allocation2 + $0x5b] sm:$0xff] %vm828_vm8, %v653_v8 }
  0xf0   : > { %875 = vst.msk [vmem:[#allocation2 + $0x5a] sm:$0xff] %vm865_vm9, %v653_v8  ;;  %v639_v8 = vmul.f32 0.01, %v595_v6 }
  0xf1   : > { %v543_v11 = vpop.f32.mrf.mxu0  ;;  %747 = vst.msk [vmem:[#allocation2 + $0x10d] sm:$0xff] %vm717_vm4, %v2058_v46 }
  0xf2   : > { %v618_v12 = vmul.f32 0.01, %v543_v11  ;;  %705 = vst.msk [vmem:[#allocation2 + $0xe6] sm:$0xff] %vm680_vm3, %v2060_v47  ;;  %v675_v9 = vmax.f32 %v595_v6, %v639_v8 }
  0xf3   : > { %v1092_v13 = vld [vmem:[#allocation2 + $0x37] ss:$2 sm:$0xff]  ;;  %742 = vst.msk [vmem:[#allocation2 + $0xe5] sm:$0xff] %vm717_vm4, %v2060_v47 }
  0xf4   : > { %v1093_v15 = vpack.c.bf16 %v1092_v13, %v1092_v13  ;;  %v654_v16 = vmax.f32 %v543_v11, %v618_v12  ;;  %779 = vst.msk [vmem:[#allocation2 + $0xe4] sm:$0xff] %vm754_vm5, %v2060_v47  ;;  %v598_v13 = vpop.f32.mrf.mxu3 }
  0xf5   : > { %816 = vst.msk [vmem:[#allocation2 + $0xd4] sm:$0xff] %vm791_vm7, %v2060_v47 }
  0xf6   : > { %1584 = vmatmul.msk.bf16.vlgmr.msrb.gmra.mxu3 %vm298_vm2, %v1093_v15  ;;  %802 = vst.msk [vmem:[#allocation2 + $0x64] sm:$0xff] %vm791_vm7, %v654_v16  ;;  %v640_v15 = vmul.f32 0.01, %v598_v13 }
  0xf7   : > { %1225 = vmatpush.bf16.msrb.mxu3 %v1898_v31  ;;  %839 = vst.msk [vmem:[#allocation2 + $0x63] sm:$0xff] %vm828_vm8, %v654_v16 }
  0xf8   : > { %876 = vst.msk [vmem:[#allocation2 + $0x62] sm:$0xff] %vm865_vm9, %v654_v16  ;;  %v676_v16 = vmax.f32 %v598_v13, %v640_v15 }
  0xf9   : > { %v545_v19 = vpop.f32.mrf.mxu0  ;;  %853 = vst.msk [vmem:[#allocation2 + $0xd3] sm:$0xff] %vm828_vm8, %v2060_v47 }
  0xfa   : > { %v619_v20 = vmul.f32 0.01, %v545_v19  ;;  %890 = vst.msk [vmem:[#allocation2 + $0xd2] sm:$0xff] %vm865_vm9, %v2060_v47 }
  0xfb   : > { %1226 = vmatpush.bf16.msrb.mxu3 %v1909_v35  ;;  %707 = vst.msk [vmem:[#allocation2 + $0xf6] sm:$0xff] %vm680_vm3, %v2073_v52 }
  0xfc   : > { %v655_v22 = vmax.f32 %v545_v19, %v619_v20  ;;  %818 = vst.msk [vmem:[#allocation2 + $0xe4] sm:$0xff] %vm791_vm7, %v2073_v52  ;;  %v1194_v20 = vld [vmem:[%s1918_s20 + $0xc] sm:$0xf] }
  0xfd   : > { %929 = vst.msk [vmem:[#allocation2 + $0xd2] sm:$0xff] %vm902_vm10, %v2073_v52 }
  0xfe   : > { %692 = vst.msk [vmem:[#allocation2 + $0x7e] sm:$0xff] %vm680_vm3, %v655_v22 }
  0xff   : > { %1227 = vmatpush.bf16.msrb.mxu3 %v1928_v38  ;;  %729 = vst.msk [vmem:[#allocation2 + $0x7d] sm:$0xff] %vm717_vm4, %v655_v22 }
 0x100   : > { %766 = vst.msk [vmem:[#allocation2 + $0x7c] sm:$0xff] %vm754_vm5, %v655_v22 }
 0x101   : > { %v548_v25 = vpop.f32.mrf.mxu0  ;;  %914 = vst.msk [vmem:[#allocation2 + $0x5a] sm:$0xff] %vm902_vm10, %v655_v22 }
 0x102   : > { %v620_v27 = vmul.f32 0.01, %v548_v25  ;;  %951 = vst.msk [vmem:[#allocation2 + $0x59] sm:$0xff] %vm939_vm11, %v655_v22 }
 0x103   : > { %988 = vst.msk [vmem:[#allocation2 + $0x58] sm:$0xff] %vm976_vm12, %v655_v22 }
 0x104   : > { %v656_v28 = vmax.f32 %v548_v25, %v620_v27  ;;  %711 = vst.msk [vmem:[#allocation2 + $0x116] sm:$0xff] %vm680_vm3, %v674_v58  ;;  %v1083_v27 = vpop.f32.mrf.mxu2 }
 0x105   : > { %748 = vst.msk [vmem:[#allocation2 + $0x115] sm:$0xff] %vm717_vm4, %v674_v58 }
 0x106   : > { %693 = vst.msk [vmem:[#allocation2 + $0x86] sm:$0xff] %vm680_vm3, %v656_v28  ;;  %1587 = vmatmul.msk.bf16.vlgmr.msra.gmra.mxu3 %vm680_vm3, %v1153_v60 }
 0x107   : > { %730 = vst.msk [vmem:[#allocation2 + $0x85] sm:$0xff] %vm717_vm4, %v656_v28  ;;  %1287 = vmatpush.bf16.msra.mxu3 %v1922_v37 }
 0x108   : > { %767 = vst.msk [vmem:[#allocation2 + $0x84] sm:$0xff] %vm754_vm5, %v656_v28 }
 0x109   : > { %v550_v34 = vpop.f32.mrf.mxu0  ;;  %915 = vst.msk [vmem:[#allocation2 + $0x62] sm:$0xff] %vm902_vm10, %v656_v28 }
 0x10a   : > { %952 = vst.msk [vmem:[#allocation2 + $0x61] sm:$0xff] %vm939_vm11, %v656_v28  ;;  %v621_v40 = vmul.f32 0.01, %v550_v34 }
 0x10b   : > { %989 = vst.msk [vmem:[#allocation2 + $0x60] sm:$0xff] %vm976_vm12, %v656_v28  ;;  %v1235_v28 = vld [vmem:[%s1918_s20 + $0x10] sm:$0xf] }
 0x10c   : > { %v657_v41 = vmax.f32 %v550_v34, %v621_v40  ;;  %785 = vst.msk [vmem:[#allocation2 + $0x114] sm:$0xff] %vm754_vm5, %v674_v58  ;;  %v1085_v33 = vpop.f32.mrf.mxu2 }
 0x10d   : > { %706 = vst.msk [vmem:[#allocation2 + $0xee] sm:$0xff] %vm680_vm3, %v2090_v59 }
 0x10e   : > { %731 = vst.msk [vmem:[#allocation2 + $0x8d] sm:$0xff] %vm717_vm4, %v657_v41 }
 0x10f   : > { %768 = vst.msk [vmem:[#allocation2 + $0x8c] sm:$0xff] %vm754_vm5, %v657_v41 }
 0x110   : > { %805 = vst.msk [vmem:[#allocation2 + $0x7c] sm:$0xff] %vm791_vm7, %v657_v41 }
 0x111   : > { %842 = vst.msk [vmem:[#allocation2 + $0x7b] sm:$0xff] %vm828_vm8, %v657_v41  ;;  %v553_v50 = vpop.f32.mrf.mxu0 }
 0x112   : > { %879 = vst.msk [vmem:[#allocation2 + $0x7a] sm:$0xff] %vm865_vm9, %v657_v41  ;;  %v622_v51 = vmul.f32 0.01, %v553_v50 }
 0x113   : > { %953 = vst.msk [vmem:[#allocation2 + $0x69] sm:$0xff] %vm939_vm11, %v657_v41 }
 0x114   : > { %990 = vst.msk [vmem:[#allocation2 + $0x68] sm:$0xff] %vm976_vm12, %v657_v41  ;;  %v658_v53 = vmax.f32 %v553_v50, %v622_v51  ;;  %v2239_v41 = vld [vmem:[%s2336_s6] ss:$0 sm:$0xff]  ;;  %v1125_v43 = vpop.f32.mrf.mxu2 }
 0x115   : > { %743 = vst.msk [vmem:[#allocation2 + $0xed] sm:$0xff] %vm717_vm4, %v2090_v59  ;;  %v1084_v49 = vadd.f32 %v2239_v41, %v1083_v27 }
 0x116   : > { %806 = vst.msk [vmem:[#allocation2 + $0x84] sm:$0xff] %vm791_vm7, %v658_v53 }
 0x117   : > { %843 = vst.msk [vmem:[#allocation2 + $0x83] sm:$0xff] %vm828_vm8, %v658_v53 }
 0x118   : > { %880 = vst.msk [vmem:[#allocation2 + $0x82] sm:$0xff] %vm865_vm9, %v658_v53  ;;  %v1126_v53 = vadd.f32 %v2239_v41, %v1125_v43 }
 0x119   : > { %744 = vst.msk [vmem:[#allocation2 + $0xf5] sm:$0xff] %vm717_vm4, %v2073_v52  ;;  %v555_v3 = vpop.f32.mrf.mxu0 }
 0x11a   : > { %780 = vst.msk [vmem:[#allocation2 + $0xec] sm:$0xff] %vm754_vm5, %v2090_v59  ;;  %v623_v4 = vmul.f32 0.01, %v555_v3 }
 0x11b   : > { %781 = vst.msk [vmem:[#allocation2 + $0xf4] sm:$0xff] %vm754_vm5, %v2073_v52  ;;  %v1133_v1 = vld [vmem:[#allocation2 + $0x5b] ss:$2 sm:$0xff] }
 0x11c   : > { %820 = vst.msk [vmem:[#allocation2 + $0xf4] sm:$0xff] %vm791_vm7, %v2045_v39  ;;  %v1134_v2 = vpack.c.bf16 %v1133_v1, %v1133_v1  ;;  %v659_v5 = vmax.f32 %v555_v3, %v623_v4 }
 0x11d   : > { %819 = vst.msk [vmem:[#allocation2 + $0xec] sm:$0xff] %vm791_vm7, %v671_v63 }
 0x11e   : > { %1586 = vmatmul.msk.bf16.vlgmr.msra.gmra.mxu1 %vm298_vm2, %v1134_v2  ;;  %856 = vst.msk [vmem:[#allocation2 + $0xeb] sm:$0xff] %vm828_vm8, %v671_v63  ;;  %v1317_v2 = vld [vmem:[%s1918_s20 + $0x18] sm:$0xf] }
 0x11f   : > { %1266 = vmatpush.bf16.msra.mxu1 %v1898_v31  ;;  %857 = vst.msk [vmem:[#allocation2 + $0xf3] sm:$0xff] %vm828_vm8, %v2045_v39 }
 0x120   : > { %893 = vst.msk [vmem:[#allocation2 + $0xea] sm:$0xff] %vm865_vm9, %v671_v63  ;;  %v1276_v63 = vld [vmem:[%s1918_s20 + $0x14] sm:$0xf] }
 0x121   : > { %894 = vst.msk [vmem:[#allocation2 + $0xf2] sm:$0xff] %vm865_vm9, %v2045_v39  ;;  %v558_v10 = vpop.f32.mrf.mxu0 }
 0x122   : > { %932 = vst.msk [vmem:[#allocation2 + $0xea] sm:$0xff] %vm902_vm10, %v2058_v46  ;;  %v624_v11 = vmul.f32 0.01, %v558_v10 }
 0x123   : > { %1267 = vmatpush.bf16.msra.mxu1 %v1909_v35  ;;  %784 = vst.msk [vmem:[#allocation2 + $0x10c] sm:$0xff] %vm754_vm5, %v2058_v46 }
 0x124   : > { %933 = vst.msk [vmem:[#allocation2 + $0xf2] sm:$0xff] %vm902_vm10, %v674_v58  ;;  %v660_v12 = vmax.f32 %v558_v10, %v624_v11 }
 0x125   : > { %969 = vst.msk [vmem:[#allocation2 + $0xe9] sm:$0xff] %vm939_vm11, %v2058_v46 }
 0x126   : > { %970 = vst.msk [vmem:[#allocation2 + $0xf1] sm:$0xff] %vm939_vm11, %v674_v58 }
 0x127   : > { %1268 = vmatpush.bf16.msra.mxu1 %v1928_v38  ;;  %1006 = vst.msk [vmem:[#allocation2 + $0xe8] sm:$0xff] %vm976_vm12, %v2058_v46 }
 0x128   : > { %1007 = vst.msk [vmem:[#allocation2 + $0xf0] sm:$0xff] %vm976_vm12, %v674_v58 }
 0x129   : > { %696 = vst.msk [vmem:[#allocation2 + $0x9e] sm:$0xff] %vm680_vm3, %v659_v5  ;;  %v560_v17 = vpop.f32.mrf.mxu0 }
 0x12a   : > { %733 = vst.msk [vmem:[#allocation2 + $0x9d] sm:$0xff] %vm717_vm4, %v659_v5  ;;  %v625_v18 = vmul.f32 0.01, %v560_v17 }
 0x12b   : > { %770 = vst.msk [vmem:[#allocation2 + $0x9c] sm:$0xff] %vm754_vm5, %v659_v5 }
 0x12c   : > { %807 = vst.msk [vmem:[#allocation2 + $0x8c] sm:$0xff] %vm791_vm7, %v659_v5  ;;  %v661_v19 = vmax.f32 %v560_v17, %v625_v18 }
 0x12d   : > { %844 = vst.msk [vmem:[#allocation2 + $0x8b] sm:$0xff] %vm828_vm8, %v659_v5 }
 0x12e   : > { %881 = vst.msk [vmem:[#allocation2 + $0x8a] sm:$0xff] %vm865_vm9, %v659_v5  ;;  %1589 = vmatmul.msk.bf16.vlgmr.msrb.gmra.mxu1 %vm680_vm3, %v1194_v20 }
 0x12f   : > { %918 = vst.msk [vmem:[#allocation2 + $0x7a] sm:$0xff] %vm902_vm10, %v659_v5  ;;  %1328 = vmatpush.bf16.msrb.mxu1 %v1922_v37 }
 0x130   : > { %955 = vst.msk [vmem:[#allocation2 + $0x79] sm:$0xff] %vm939_vm11, %v659_v5 }
 0x131   : > { %992 = vst.msk [vmem:[#allocation2 + $0x78] sm:$0xff] %vm976_vm12, %v659_v5  ;;  %v1358_v5 = vld [vmem:[%s1918_s20 + $0x1c] sm:$0xf]  ;;  %s1391_s20 = sshll.u32 %s2261_s14, 4  ;;  %s1392_s20 = int_to_ptr.vmem [resolvable:$true] %s1391_s20 }
 0x132   : > { %749 = vst.msk [vmem:[#allocation2 + $0x11d] sm:$0xff] %vm717_vm4, %v675_v9 }
 0x133   : > { %786 = vst.msk [vmem:[#allocation2 + $0x11c] sm:$0xff] %vm754_vm5, %v675_v9 }
 0x134   : > { %823 = vst.msk [vmem:[#allocation2 + $0x10c] sm:$0xff] %vm791_vm7, %v675_v9 }
 0x135   : > { %860 = vst.msk [vmem:[#allocation2 + $0x10b] sm:$0xff] %vm828_vm8, %v675_v9 }
 0x136   : > { %897 = vst.msk [vmem:[#allocation2 + $0x10a] sm:$0xff] %vm865_vm9, %v675_v9 }
 0x137   : > { %971 = vst.msk [vmem:[#allocation2 + $0xf9] sm:$0xff] %vm939_vm11, %v675_v9 }
 0x138   : > { %1008 = vst.msk [vmem:[#allocation2 + $0xf8] sm:$0xff] %vm976_vm12, %v675_v9 }
 0x139   : > { %697 = vst.msk [vmem:[#allocation2 + $0xa6] sm:$0xff] %vm680_vm3, %v660_v12 }
 0x13a   : > { %734 = vst.msk [vmem:[#allocation2 + $0xa5] sm:$0xff] %vm717_vm4, %v660_v12 }
 0x13b   : > { %771 = vst.msk [vmem:[#allocation2 + $0xa4] sm:$0xff] %vm754_vm5, %v660_v12 }
 0x13c   : > { %810 = vst.msk [vmem:[#allocation2 + $0xa4] sm:$0xff] %vm791_vm7, %v1979_v0 }
 0x13d   : > { %919 = vst.msk [vmem:[#allocation2 + $0x82] sm:$0xff] %vm902_vm10, %v660_v12 }
 0x13e   : > { %956 = vst.msk [vmem:[#allocation2 + $0x81] sm:$0xff] %vm939_vm11, %v660_v12 }
 0x13f   : > { %993 = vst.msk [vmem:[#allocation2 + $0x80] sm:$0xff] %vm976_vm12, %v660_v12  ;;  %v1297_v50 = vld [vmem:[#allocation2 + $0xeb] ss:$2 sm:$0xff] }
 0x140   : > { %824 = vst.msk [vmem:[#allocation2 + $0x114] sm:$0xff] %vm791_vm7, %v676_v16 }
 0x141   : > { %861 = vst.msk [vmem:[#allocation2 + $0x113] sm:$0xff] %vm828_vm8, %v676_v16 }
 0x142   : > { %898 = vst.msk [vmem:[#allocation2 + $0x112] sm:$0xff] %vm865_vm9, %v676_v16 }
 0x143   : > { %698 = vst.msk [vmem:[#allocation2 + $0xae] sm:$0xff] %vm680_vm3, %v661_v19 }
 0x144   : > { %735 = vst.msk [vmem:[#allocation2 + $0xad] sm:$0xff] %vm717_vm4, %v661_v19 }
 0x145   : > { %772 = vst.msk [vmem:[#allocation2 + $0xac] sm:$0xff] %vm754_vm5, %v661_v19 }
 0x146   : > { %809 = vst.msk [vmem:[#allocation2 + $0x9c] sm:$0xff] %vm791_vm7, %v661_v19 }
 0x147   : > { %811 = vst.msk [vmem:[#allocation2 + $0xac] sm:$0xff] %vm791_vm7, %v1993_v7 }
 0x148   : > { %847 = vst.msk [vmem:[#allocation2 + $0xa3] sm:$0xff] %vm828_vm8, %v1979_v0 }
 0x149   : > { %848 = vst.msk [vmem:[#allocation2 + $0xab] sm:$0xff] %vm828_vm8, %v1993_v7 }
 0x14a   : > { %851 = vst.msk [vmem:[#allocation2 + $0xc3] sm:$0xff] %vm828_vm8, %v2027_v26 }
 0x14b   : > { %884 = vst.msk [vmem:[#allocation2 + $0xa2] sm:$0xff] %vm865_vm9, %v1979_v0  ;;  %v600_v0 = vpop.f32.mrf.mxu3 }
 0x14c   : > { %885 = vst.msk [vmem:[#allocation2 + $0xaa] sm:$0xff] %vm865_vm9, %v1993_v7  ;;  %v641_v7 = vmul.f32 0.01, %v600_v0 }
 0x14d   : > { %920 = vst.msk [vmem:[#allocation2 + $0x8a] sm:$0xff] %vm902_vm10, %v661_v19 }
 0x14e   : > { %923 = vst.msk [vmem:[#allocation2 + $0xa2] sm:$0xff] %vm902_vm10, %v2001_v14  ;;  %v677_v22 = vmax.f32 %v600_v0, %v641_v7 }
 0x14f   : > { %924 = vst.msk [vmem:[#allocation2 + $0xaa] sm:$0xff] %vm902_vm10, %v2016_v21 }
 0x150   : > { %957 = vst.msk [vmem:[#allocation2 + $0x89] sm:$0xff] %vm939_vm11, %v661_v19 }
 0x151   : > { %960 = vst.msk [vmem:[#allocation2 + $0xa1] sm:$0xff] %vm939_vm11, %v2001_v14 }
 0x152   : > { %994 = vst.msk [vmem:[#allocation2 + $0x88] sm:$0xff] %vm976_vm12, %v661_v19 }
 0x153   : > { %888 = vst.msk [vmem:[#allocation2 + $0xc2] sm:$0xff] %vm865_vm9, %v2027_v26  ;;  %v603_v25 = vpop.f32.mrf.mxu3 }
 0x154   : > { %889 = vst.msk [vmem:[#allocation2 + $0xca] sm:$0xff] %vm865_vm9, %v2042_v36  ;;  %v642_v30 = vmul.f32 0.01, %v603_v25 }
 0x155   : > { %961 = vst.msk [vmem:[#allocation2 + $0xa9] sm:$0xff] %vm939_vm11, %v2016_v21 }
 0x156   : > { %997 = vst.msk [vmem:[#allocation2 + $0xa0] sm:$0xff] %vm976_vm12, %v2001_v14  ;;  %v1058_v14 = vpop.f32.mrf.mxu1 }
 0x157   : > { %825 = vst.msk [vmem:[#allocation2 + $0x11c] sm:$0xff] %vm791_vm7, %v677_v22  ;;  %v1059_v34 = vadd.f32 %v2225_v32, %v1058_v14 }
 0x158   : > { %862 = vst.msk [vmem:[#allocation2 + $0x11b] sm:$0xff] %vm828_vm8, %v677_v22 }
 0x159   : > { %v1174_v23 = vld [vmem:[#allocation2 + $0x7f] ss:$2 sm:$0xff]  ;;  %899 = vst.msk [vmem:[#allocation2 + $0x11a] sm:$0xff] %vm865_vm9, %v677_v22  ;;  %v1062_v40 = vmul.f32 0.01, %v1059_v34 }
 0x15a   : > { %v1175_v24 = vpack.c.bf16 %v1174_v23, %v1174_v23  ;;  %936 = vst.msk [vmem:[#allocation2 + $0x10a] sm:$0xff] %vm902_vm10, %v677_v22 }
 0x15b   : > { %973 = vst.msk [vmem:[#allocation2 + $0x109] sm:$0xff] %vm939_vm11, %v677_v22  ;;  %v1063_v48 = vmax.f32 %v1059_v34, %v1062_v40 }
 0x15c   : > { %1588 = vmatmul.msk.bf16.vlgmr.msrb.gmra.mxu2 %vm298_vm2, %v1175_v24  ;;  %1010 = vst.msk [vmem:[#allocation2 + $0x108] sm:$0xff] %vm976_vm12, %v677_v22 }
 0x15d   : > { %1307 = vmatpush.bf16.msrb.mxu2 %v1898_v31  ;;  %927 = vst.msk [vmem:[#allocation2 + $0xc2] sm:$0xff] %vm902_vm10, %v2060_v47  ;;  %v1087_v55 = vadd.f32 %v1084_v49, %v1063_v48 }
 0x15e   : > { %928 = vst.msk [vmem:[#allocation2 + $0xca] sm:$0xff] %vm902_vm10, %v2090_v59  ;;  %v1060_v29 = vpop.f32.mrf.mxu1 }
 0x15f   : > { %962 = vst.msk [vmem:[#allocation2 + $0xb1] sm:$0xff] %vm939_vm11, %v2027_v26  ;;  %v1088_v61 = vmul.f32 0.70710677, %v1087_v55 }
 0x160   : > { %998 = vst.msk [vmem:[#allocation2 + $0xa8] sm:$0xff] %vm976_vm12, %v2016_v21  ;;  %v605_v21 = vpop.f32.mrf.mxu3 }
 0x161   : > { %1308 = vmatpush.bf16.msrb.mxu2 %v1909_v35  ;;  %964 = vst.msk [vmem:[#allocation2 + $0xc1] sm:$0xff] %vm939_vm11, %v2060_v47  ;;  %v643_v42 = vmul.f32 0.01, %v605_v21 }
 0x162   : > { %965 = vst.msk [vmem:[#allocation2 + $0xc9] sm:$0xff] %vm939_vm11, %v2090_v59 }
 0x163   : > { %966 = vst.msk [vmem:[#allocation2 + $0xd1] sm:$0xff] %vm939_vm11, %v2073_v52  ;;  %v679_v51 = vmax.f32 %v605_v21, %v643_v42 }
 0x164   : > { %999 = vst.msk [vmem:[#allocation2 + $0xb0] sm:$0xff] %vm976_vm12, %v2027_v26  ;;  %v678_v26 = vmax.f32 %v603_v25, %v642_v30 }
 0x165   : > { %1309 = vmatpush.bf16.msrb.mxu2 %v1928_v38  ;;  %1001 = vst.msk [vmem:[#allocation2 + $0xc0] sm:$0xff] %vm976_vm12, %v2060_v47 }
 0x166   : > { %1002 = vst.msk [vmem:[#allocation2 + $0xc8] sm:$0xff] %vm976_vm12, %v2090_v59  ;;  %v1127_v59 = vpop.f32.mrf.mxu2 }
 0x167   : > { %1003 = vst.msk [vmem:[#allocation2 + $0xd0] sm:$0xff] %vm976_vm12, %v2073_v52 }
 0x168   : > { %937 = vst.msk [vmem:[#allocation2 + $0x112] sm:$0xff] %vm902_vm10, %v678_v26 }
 0x169   : > { %974 = vst.msk [vmem:[#allocation2 + $0x111] sm:$0xff] %vm939_vm11, %v678_v26 }
 0x16a   : > { %1011 = vst.msk [vmem:[#allocation2 + $0x110] sm:$0xff] %vm976_vm12, %v678_v26 }
 0x16b   : > { %v1215_v36 = vld [vmem:[#allocation2 + $0xa3] ss:$2 sm:$0xff]  ;;  %938 = vst.msk [vmem:[#allocation2 + $0x11a] sm:$0xff] %vm902_vm10, %v679_v51 }
 0x16c   : > { %1591 = vmatmul.msk.bf16.vlgmr.msra.gmra.mxu2 %vm680_vm3, %v1235_v28  ;;  %v1216_v39 = vpack.c.bf16 %v1215_v36, %v1215_v36  ;;  %975 = vst.msk [vmem:[#allocation2 + $0x119] sm:$0xff] %vm939_vm11, %v679_v51 }
 0x16d   : > { %1369 = vmatpush.bf16.msra.mxu2 %v1922_v37  ;;  %1012 = vst.msk [vmem:[#allocation2 + $0x118] sm:$0xff] %vm976_vm12, %v679_v51 }
 0x16e   : > { %1590 = vmatmul.msk.bf16.vlgmr.msrb.gmra.mxu3 %vm298_vm2, %v1216_v39  ;;  %v1256_v44 = vld [vmem:[#allocation2 + $0xc7] ss:$2 sm:$0xff]  ;;  %1090 = vst.msk [vmem:[%s2261_s14] sm:$0xff] %vm1089_vm13, %v1088_v61 }
 0x16f   : > { %1348 = vmatpush.bf16.msrb.mxu3 %v1898_v31  ;;  %v1257_v47 = vpack.c.bf16 %v1256_v44, %v1256_v44  ;;  %v1298_v31 = vpack.c.bf16 %v1297_v50, %v1297_v50 }
 0x171   : > { %1592 = vmatmul.msk.bf16.vlgmr.msra.gmra.mxu1 %vm298_vm2, %v1257_v47 }
 0x173   : > { %1349 = vmatpush.bf16.msrb.mxu3 %v1909_v35 }
 0x174   : > { %v1338_v9 = vld [vmem:[#allocation2 + $0x10f] ss:$2 sm:$0xff] }
 0x175   : > { %v1339_v10 = vpack.c.bf16 %v1338_v9, %v1338_v9 }
 0x177   : > { %1350 = vmatpush.bf16.msrb.mxu3 %v1928_v38 }
 0x179   : > { %v1106_v37 = vpop.f32.mrf.mxu3 }
 0x17a   : > { %v1107_v45 = vadd.f32 %v2225_v32, %v1106_v37 }
 0x17c   : > { %v1110_v52 = vmul.f32 0.01, %v1107_v45  ;;  %1594 = vmatmul.msk.bf16.vlgmr.msrb.gmra.mxu2 %vm298_vm2, %v1298_v31 }
 0x17e   : > { %v1111_v54 = vmax.f32 %v1107_v45, %v1110_v52  ;;  %1593 = vmatmul.msk.bf16.vlgmr.msra.gmra.mxu3 %vm680_vm3, %v1276_v63 }
 0x180   : > { %v1129_v56 = vadd.f32 %v1126_v53, %v1111_v54 }
 0x181   : > { %v1108_v58 = vpop.f32.mrf.mxu3  ;;  %1595 = vmatmul.msk.bf16.vlgmr.msrb.gmra.mxu1 %vm680_vm3, %v1317_v2 }
 0x182   : > { %v1130_v35 = vmul.f32 0.70710677, %v1129_v56 }
 0x184   : > { %1131 = vst.msk [vmem:[%s2261_s14 + $0x8] sm:$0xff] %vm1089_vm13, %v1130_v35 }
 0x189   : > { %v1166_v1 = vpop.f32.mrf.mxu3 }
 0x18a   : > { %v1167_v3 = vadd.f32 %v2239_v41, %v1166_v1 }
 0x18c   : > { %1597 = vmatmul.msk.bf16.vlgmr.msra.gmra.mxu2 %vm680_vm3, %v1358_v5 }
 0x18e   : > { %1596 = vmatmul.msk.bf16.vlgmr.msrb.gmra.mxu3 %vm298_vm2, %v1339_v10 }
 0x191   : > { %v1168_v8 = vpop.f32.mrf.mxu3 }
 0x19b   : > { %v1147_v46 = vpop.f32.mrf.mxu1 }
 0x19c   : > { %v1148_v57 = vadd.f32 %v2225_v32, %v1147_v46 }
 0x19e   : > { %v1151_v62 = vmul.f32 0.01, %v1148_v57 }
 0x1a0   : > { %v1152_v38 = vmax.f32 %v1148_v57, %v1151_v62 }
 0x1a2   : > { %v1170_v4 = vadd.f32 %v1167_v3, %v1152_v38 }
 0x1a3   : > { %v1149_v60 = vpop.f32.mrf.mxu1 }
 0x1a4   : > { %v1171_v6 = vmul.f32 0.70710677, %v1170_v4 }
 0x1a6   : > { %1172 = vst.msk [vmem:[%s2261_s14 + $0x10] sm:$0xff] %vm1089_vm13, %v1171_v6 }
 0x1ab   : > { %v1207_v11 = vpop.f32.mrf.mxu1 }
 0x1ac   : > { %v1208_v16 = vadd.f32 %v2239_v41, %v1207_v11 }
 0x1b3   : > { %v1209_v12 = vpop.f32.mrf.mxu1 }
 0x1df   : > { %v1188_v13 = vpop.f32.mrf.mxu2 }
 0x1e0   : > { %v1189_v15 = vadd.f32 %v2225_v32, %v1188_v13 }
 0x1e2   : > { %v1192_v17 = vmul.f32 0.01, %v1189_v15 }
 0x1e4   : > { %v1193_v18 = vmax.f32 %v1189_v15, %v1192_v17 }
 0x1e6   : > { %v1211_v19 = vadd.f32 %v1208_v16, %v1193_v18 }
 0x1e7   : > { %v1190_v20 = vpop.f32.mrf.mxu2 }
 0x1e8   : > { %v1212_v0 = vmul.f32 0.70710677, %v1211_v19 }
 0x1ea   : > { %1213 = vst.msk [vmem:[%s2261_s14 + $0x18] sm:$0xff] %vm1089_vm13, %v1212_v0 }
 0x1ee   : > { %v1270_v22 = vpop.f32.mrf.mxu1 }
 0x1ef   : > { %v1248_v7 = vpop.f32.mrf.mxu2  ;;  %v1271_v34 = vadd.f32 %v2225_v32, %v1270_v22 }
 0x1f0   : > { %v1249_v27 = vadd.f32 %v2239_v41, %v1248_v7 }
 0x1f1   : > { %v1229_v24 = vpop.f32.mrf.mxu3  ;;  %v1274_v40 = vmul.f32 0.01, %v1271_v34 }
 0x1f2   : > { %v1230_v14 = vadd.f32 %v2225_v32, %v1229_v24 }
 0x1f3   : > { %v1275_v46 = vmax.f32 %v1271_v34, %v1274_v40 }
 0x1f4   : > { %v1233_v25 = vmul.f32 0.01, %v1230_v14 }
 0x1f6   : > { %v1234_v28 = vmax.f32 %v1230_v14, %v1233_v25  ;;  %v1272_v29 = vpop.f32.mrf.mxu1 }
 0x1f7   : > { %v1250_v23 = vpop.f32.mrf.mxu2 }
 0x1f8   : > { %v1252_v30 = vadd.f32 %v1249_v27, %v1234_v28 }
 0x1f9   : > { %v1231_v33 = vpop.f32.mrf.mxu3 }
 0x1fa   : > { %v1253_v36 = vmul.f32 0.70710677, %v1252_v30 }
 0x1fc   : > { %1254 = vst.msk [vmem:[%s2261_s14 + $0x20] sm:$0xff] %vm1089_vm13, %v1253_v36 }
 0x1fe   : > { %v1330_v37 = vpop.f32.mrf.mxu1 }
 0x1ff   : > { %v1311_v21 = vpop.f32.mrf.mxu2  ;;  %v1331_v43 = vadd.f32 %v2239_v41, %v1330_v37 }
 0x200   : > { %v1312_v26 = vadd.f32 %v2225_v32, %v1311_v21 }
 0x201   : > { %v1289_v45 = vpop.f32.mrf.mxu3 }
 0x202   : > { %v1315_v39 = vmul.f32 0.01, %v1312_v26  ;;  %v1290_v47 = vadd.f32 %v2239_v41, %v1289_v45 }
 0x204   : > { %v1316_v42 = vmax.f32 %v1312_v26, %v1315_v39  ;;  %v1293_v49 = vadd.f32 %v1290_v47, %v1275_v46 }
 0x206   : > { %v1334_v48 = vadd.f32 %v1331_v43, %v1316_v42  ;;  %v1294_v51 = vmul.f32 0.70710677, %v1293_v49  ;;  %v1332_v52 = vpop.f32.mrf.mxu1 }
 0x207   : > { %v1313_v44 = vpop.f32.mrf.mxu2 }
 0x208   : > { %v1335_v50 = vmul.f32 0.70710677, %v1334_v48  ;;  %1295 = vst.msk [vmem:[%s2261_s14 + $0x28] sm:$0xff] %vm1089_vm13, %v1294_v51 }
 0x209   : > { %v1291_v31 = vpop.f32.mrf.mxu3 }
 0x20a   : > { %1336 = vst.msk [vmem:[%s2261_s14 + $0x30] sm:$0xff] %vm1089_vm13, %v1335_v50 }
 0x20f   : > { %v1371_v53 = vpop.f32.mrf.mxu2 }
 0x210   : > { %v1372_v58 = vadd.f32 %v2239_v41, %v1371_v53 }
 0x211   : > { %v1352_v55 = vpop.f32.mrf.mxu3 }
 0x212   : > { %v1353_v56 = vadd.f32 %v2225_v32, %v1352_v55 }
 0x214   : > { %v1356_v57 = vmul.f32 0.01, %v1353_v56 }
 0x216   : > { %v1357_v59 = vmax.f32 %v1353_v56, %v1356_v57 }
 0x217   : > { %v1373_v54 = vpop.f32.mrf.mxu2 }
 0x218   : > { %v1375_v60 = vadd.f32 %v1372_v58, %v1357_v59 }
 0x219   : > { %v1354_v61 = vpop.f32.mrf.mxu3 }
 0x21a   : > { %v1376_v35 = vmul.f32 0.70710677, %v1375_v60 }
 0x21c   : > { %1377 = vst.msk [vmem:[%s2261_s14 + $0x38] sm:$0xff] %vm1089_vm13, %v1376_v35 }
 0x21d   : > { %1708 = shalt.err (!%p1705_p3)
}
 0x21e   : > { %s1746_s9 = smov 128   ;;  %s1747_s14 = smov 8  }
 0x21f   : > { %1637 = dma.vmem_to_hbm [thread:$0]  (%p1826_p5), %s1392_s20, 1024, %s1394_s15, %s1379_s28, %s1746_s9, %s1746_s9, %s1747_s14  }
 0x220 PF: > { %p1643_p4 = scmp.ge.s32.totalorder %s1743_s27, 2  ;;  %s1408_s17 = sand.u32 1, %s1731_s24  }
 0x221   : > { %s1409_s18 = scalar_lea.sflag [#allocation4], %s1408_s17 }
 0x222   : > { %p1640_p7 = pnand %p1643_p4, %p1830_p6 }
 0x224   : > { %p1641_p8 = pneg %p1640_p7 }
 0x226   : > { %1726 = dma.done.wait (%p1641_p8), %s1409_s18, 1024  }
 0x227   : > { %1728 = vsyncadd (%p1641_p8), %s1409_s18, 4294966272  ;;  %p17_p9 = scmp.ge.s32.totalorder %s1813_s30, 4   ;;  %s2340_s24 = smov %s1735_s25 }
 0x228   : > { %s2341_s25 = smov %s1739_s26  ;;  %s2342_s26 = smov %s1824_s10 }
 0x229   : > { %s2343_s27 = smov %s1813_s30  ;;  %19 = sbr.rel (!%p17_p9) target bundleno = 3 (0x3), region = 94 }
 0x22e   :  { %1415 = vsyncpa [#allocation4], 1 }
 0x22f   :  { %1417 = vsyncpa [#allocation4 + $0x1], 1 }

</bundles_post_ra>
